<compile_context>
chip_gen: v6e
topology: v6e:2x2x1
jax: 0.10.0
libtpu: 0.0.40
codegen_flags: <defaults>
</compile_context>

<pallas_src>
import math
import functools

import jax
import jax.numpy as jnp
from jax.experimental import pallas as pl
from jax.experimental.pallas import tpu as pltpu

# ----- tiny-BERT config (small shapes consistent with the module) -----
B, S, D, H, L = 2, 8, 32, 4, 2        # batch, seq, hidden, heads, layers
DH = D // H                            # head dim
INTER = 64                             # FFN intermediate
VOCAB, TYPE_VOCAB, MAX_POS = 100, 2, 16
NUM_LABELS = 2
LN_EPS = 1e-12


def _vmem_spec():
    """Whole-array, VMEM-resident block (no grid → single DMA per array)."""
    return pl.BlockSpec(memory_space=pltpu.MemorySpace.VMEM)


# ---------------- the single fused, grid-free kernel ----------------
def _bert_kernel(
    # inputs
    emb_ref, mask_ref, emb_g_ref, emb_b_ref,
    qkv_w_ref, qkv_b_ref, o_w_ref, o_b_ref,
    ln1_g_ref, ln1_b_ref, ff1_w_ref, ff1_b_ref, ff2_w_ref, ff2_b_ref,
    ln2_g_ref, ln2_b_ref,
    pool_w_ref, pool_b_ref, cls_w_ref, cls_b_ref,
    # outputs
    hidden_ref, attn_ref, pooled_ref, logits_ref,
):
    scale = 1.0 / math.sqrt(DH)

    def _ln(x, g, b):
        mu = jnp.mean(x, axis=-1, keepdims=True)
        var = jnp.mean(jnp.square(x - mu), axis=-1, keepdims=True)
        return (x - mu) * jax.lax.rsqrt(var + LN_EPS) * g + b

    def _gelu(x):
        # TODO(synk): HF BERT default act is erf-GELU; tanh-approx used for TPU lowering.
        c = math.sqrt(2.0 / math.pi)
        return 0.5 * x * (1.0 + jnp.tanh(c * (x + 0.044715 * x * x * x)))

    mask = mask_ref[...]                                   # [B, 1, S] additive

    # ----- embedding LayerNorm (hidden_states[0]) -----
    hs = _ln(emb_ref[...], emb_g_ref[...], emb_b_ref[...])  # [B*S, D]
    hidden_ref[0] = hs

    # ----- transformer layers, statically unrolled -----
    for l in range(L):
        # fused Q/K/V projection: one [B*S, D] @ [D, 3D] matmul
        qkv = (jnp.dot(hs, qkv_w_ref[l], preferred_element_type=jnp.float32)
               + qkv_b_ref[l])                             # [B*S, 3D]

        # attention: batched over B per head; heads unrolled (H=4)
        ctx_heads = []
        for h in range(H):
            q_h = qkv[:, h * DH:(h + 1) * DH].reshape(B, S, DH)
            k_h = qkv[:, D + h * DH:D + (h + 1) * DH].reshape(B, S, DH)
            v_h = qkv[:, 2 * D + h * DH:2 * D + (h + 1) * DH].reshape(B, S, DH)

            s_h = (jnp.einsum("bqd,bkd->bqk", q_h, k_h,
                              preferred_element_type=jnp.float32) * scale + mask)
            s_h = s_h - jnp.max(s_h, axis=-1, keepdims=True)
            e_h = jnp.exp(s_h)
            p_h = e_h / jnp.sum(e_h, axis=-1, keepdims=True)   # exact softmax

            attn_ref[l, h] = p_h.astype(attn_ref.dtype)         # [B, S, S]

            ctx_heads.append(
                jnp.einsum("bqk,bkd->bqd", p_h, v_h,
                           preferred_element_type=jnp.float32).reshape(B * S, DH))

        # head-merge (lane concat) + single output-projection matmul
        ctx = jnp.concatenate(ctx_heads, axis=-1)            # [B*S, D]
        attn_out = (jnp.dot(ctx, o_w_ref[l], preferred_element_type=jnp.float32)
                    + o_b_ref[l])

        # residual + LN1
        hs1 = _ln(attn_out + hs, ln1_g_ref[l], ln1_b_ref[l])

        # FFN + residual + LN2
        inter = _gelu(jnp.dot(hs1, ff1_w_ref[l],
                              preferred_element_type=jnp.float32) + ff1_b_ref[l])
        ffn = (jnp.dot(inter, ff2_w_ref[l],
                       preferred_element_type=jnp.float32) + ff2_b_ref[l])
        hs = _ln(ffn + hs1, ln2_g_ref[l], ln2_b_ref[l])
        hidden_ref[l + 1] = hs

    # ----- pooler (CLS token + tanh dense) + classifier -----
    cls_tok = hs.reshape(B, S, D)[:, 0, :]                    # [B, D]
    pooled = jnp.tanh(jnp.dot(cls_tok, pool_w_ref[...],
                              preferred_element_type=jnp.float32) + pool_b_ref[...])
    pooled_ref[...] = pooled.astype(pooled_ref.dtype)
    logits_ref[...] = (jnp.dot(pooled, cls_w_ref[...],
                               preferred_element_type=jnp.float32)
                       + cls_b_ref[...]).astype(logits_ref.dtype)


def fused_bert_encoder(emb2, ext_mask, p, packed):
    n_inputs = 20
    out_shape = (
        jax.ShapeDtypeStruct((L + 1, B * S, D), jnp.float32),   # all hidden states
        jax.ShapeDtypeStruct((L, H, B, S, S), jnp.float32),     # attention probs
        jax.ShapeDtypeStruct((B, D), jnp.float32),              # pooler output
        jax.ShapeDtypeStruct((B, NUM_LABELS), jnp.float32),     # logits
    )
    return pl.pallas_call(
        _bert_kernel,
        out_shape=out_shape,
        in_specs=[_vmem_spec() for _ in range(n_inputs)],
        out_specs=tuple(_vmem_spec() for _ in range(4)),
    )(emb2, ext_mask,
      p["emb_ln_g"].reshape(1, D), p["emb_ln_b"].reshape(1, D),
      packed["qkv_w"], packed["qkv_b"], packed["o_w"], packed["o_b"],
      packed["ln1_g"], packed["ln1_b"], packed["ff1_w"], packed["ff1_b"],
      packed["ff2_w"], packed["ff2_b"], packed["ln2_g"], packed["ln2_b"],
      p["pool_w"], p["pool_b"].reshape(1, D),
      p["cls_w"], p["cls_b"].reshape(1, NUM_LABELS))


# ---------------- parameter init (deterministic, synthetic) ----------------
def init_params(seed=0):
    key = jax.random.PRNGKey(seed)

    def nxt():
        nonlocal key
        key, sub = jax.random.split(key)
        return sub

    p = {}
    p["word_emb"] = 0.02 * jax.random.normal(nxt(), (VOCAB, D), jnp.float32)
    p["pos_emb"] = 0.02 * jax.random.normal(nxt(), (MAX_POS, D), jnp.float32)
    p["type_emb"] = 0.02 * jax.random.normal(nxt(), (TYPE_VOCAB, D), jnp.float32)
    p["emb_ln_g"] = jnp.ones((D,), jnp.float32)
    p["emb_ln_b"] = jnp.zeros((D,), jnp.float32)
    p["layers"] = []
    for _ in range(L):
        lp = {}
        for name, (fi, fo) in {"q": (D, D), "k": (D, D), "v": (D, D), "o": (D, D),
                               "ff1": (D, INTER), "ff2": (INTER, D)}.items():
            lp[name + "_w"] = 0.02 * jax.random.normal(nxt(), (fi, fo), jnp.float32)
            lp[name + "_b"] = jnp.zeros((fo,), jnp.float32)
        lp["ln1_g"] = jnp.ones((D,), jnp.float32)
        lp["ln1_b"] = jnp.zeros((D,), jnp.float32)
        lp["ln2_g"] = jnp.ones((D,), jnp.float32)
        lp["ln2_b"] = jnp.zeros((D,), jnp.float32)
        p["layers"].append(lp)
    p["pool_w"] = 0.02 * jax.random.normal(nxt(), (D, D), jnp.float32)
    p["pool_b"] = jnp.zeros((D,), jnp.float32)
    p["cls_w"] = 0.02 * jax.random.normal(nxt(), (D, NUM_LABELS), jnp.float32)
    p["cls_b"] = jnp.zeros((NUM_LABELS,), jnp.float32)
    # parity with the torch module's unused self.linear / self.softmax heads
    p["extra_w"] = 0.02 * jax.random.normal(nxt(), (D, 2), jnp.float32)
    p["extra_b"] = jnp.zeros((2,), jnp.float32)
    return p


def pack_layer_params(p):
    """Stack per-layer params with a leading L axis; fuse Q/K/V weights into [D, 3D]."""
    layers = p["layers"]
    return dict(
        qkv_w=jnp.stack([jnp.concatenate([lp["q_w"], lp["k_w"], lp["v_w"]], axis=1)
                         for lp in layers]),
        qkv_b=jnp.stack([jnp.concatenate([lp["q_b"], lp["k_b"], lp["v_b"]],
                                         axis=0).reshape(1, 3 * D) for lp in layers]),
        o_w=jnp.stack([lp["o_w"] for lp in layers]),
        o_b=jnp.stack([lp["o_b"].reshape(1, D) for lp in layers]),
        ln1_g=jnp.stack([lp["ln1_g"].reshape(1, D) for lp in layers]),
        ln1_b=jnp.stack([lp["ln1_b"].reshape(1, D) for lp in layers]),
        ff1_w=jnp.stack([lp["ff1_w"] for lp in layers]),
        ff1_b=jnp.stack([lp["ff1_b"].reshape(1, INTER) for lp in layers]),
        ff2_w=jnp.stack([lp["ff2_w"] for lp in layers]),
        ff2_b=jnp.stack([lp["ff2_b"].reshape(1, D) for lp in layers]),
        ln2_g=jnp.stack([lp["ln2_g"].reshape(1, D) for lp in layers]),
        ln2_b=jnp.stack([lp["ln2_b"].reshape(1, D) for lp in layers]),
    )


# ---------------- BERT forward (thin glue around the single fused kernel) ----------------
def bert_sentiment_forward(params, input_ids, attention_mask, token_type_ids,
                           position_ids, output_hidden_states=True,
                           output_attentions=True):
    # embedding table lookups are glue (no compute to speak of)
    emb = (jnp.take(params["word_emb"], input_ids, axis=0)
           + jnp.take(params["pos_emb"], position_ids, axis=0)
           + jnp.take(params["type_emb"], token_type_ids, axis=0))       # [B, S, D]
    emb2 = emb.reshape(B * S, D).astype(jnp.float32)

    ext_mask = ((1.0 - attention_mask.astype(jnp.float32)) * -10000.0
                ).reshape(B, 1, S)                                       # additive

    packed = pack_layer_params(params)
    hidden_all, attn_all, pooled, logits = fused_bert_encoder(
        emb2, ext_mask, params, packed)

    hidden_states = tuple(hidden_all[i].reshape(B, S, D) for i in range(L + 1))
    attentions = tuple(attn_all[i].transpose(1, 0, 2, 3) for i in range(L))  # [B,H,S,S]

    out = {
        "logits": logits,
        "pooler_output": pooled,
        "hidden_states": hidden_states if output_hidden_states else None,
        "attentions": attentions if output_attentions else None,
    }
    # mirrors torch forward: return (out, out.hidden_states, out.attentions)
    return out, out["hidden_states"], out["attentions"]


if __name__ == "__main__":
    params = init_params(0)

    key = jax.random.PRNGKey(0)
    input_ids = jax.random.randint(key, (B, S), 0, VOCAB)
    attention_mask = jnp.ones((B, S), jnp.int32).at[1, -2:].set(0)  # pad tail of seq 1
    token_type_ids = jnp.zeros((B, S), jnp.int32)
    position_ids = jnp.broadcast_to(jnp.arange(S, dtype=jnp.int32), (B, S))

    fwd = jax.jit(functools.partial(bert_sentiment_forward,
                                    output_hidden_states=True,
                                    output_attentions=True))
    out, hidden_states, attentions = fwd(params, input_ids, attention_mask,
                                         token_type_ids, position_ids)

    jax.block_until_ready(out["logits"])
    jax.block_until_ready(hidden_states)
    jax.block_until_ready(attentions)

    assert out["logits"].shape == (B, NUM_LABELS)
    assert out["pooler_output"].shape == (B, D)
    assert len(hidden_states) == L + 1 and hidden_states[0].shape == (B, S, D)
    assert len(attentions) == L and attentions[0].shape == (B, H, S, S)
    # attention rows over all keys must sum to ~1 (exact softmax now)
    assert bool(jnp.all(jnp.abs(jnp.sum(attentions[0], axis=-1) - 1.0) < 1e-3))
    print("KERNEL_OK")
</pallas_src>

<mosaic_0001>
module attributes {stable_mosaic.version = 11 : i64} {
  func.func @_bert_kernel(%arg0: memref<16x32xf32, #tpu.memory_space<vmem>>, %arg1: memref<2x1x8xf32, #tpu.memory_space<vmem>>, %arg2: memref<1x32xf32, #tpu.memory_space<vmem>>, %arg3: memref<1x32xf32, #tpu.memory_space<vmem>>, %arg4: memref<2x32x96xf32, #tpu.memory_space<vmem>>, %arg5: memref<2x1x96xf32, #tpu.memory_space<vmem>>, %arg6: memref<2x32x32xf32, #tpu.memory_space<vmem>>, %arg7: memref<2x1x32xf32, #tpu.memory_space<vmem>>, %arg8: memref<2x1x32xf32, #tpu.memory_space<vmem>>, %arg9: memref<2x1x32xf32, #tpu.memory_space<vmem>>, %arg10: memref<2x32x64xf32, #tpu.memory_space<vmem>>, %arg11: memref<2x1x64xf32, #tpu.memory_space<vmem>>, %arg12: memref<2x64x32xf32, #tpu.memory_space<vmem>>, %arg13: memref<2x1x32xf32, #tpu.memory_space<vmem>>, %arg14: memref<2x1x32xf32, #tpu.memory_space<vmem>>, %arg15: memref<2x1x32xf32, #tpu.memory_space<vmem>>, %arg16: memref<32x32xf32, #tpu.memory_space<vmem>>, %arg17: memref<1x32xf32, #tpu.memory_space<vmem>>, %arg18: memref<32x2xf32, #tpu.memory_space<vmem>>, %arg19: memref<1x2xf32, #tpu.memory_space<vmem>>, %arg20: memref<3x16x32xf32, #tpu.memory_space<vmem>>, %arg21: memref<2x4x2x8x8xf32, #tpu.memory_space<vmem>>, %arg22: memref<2x32xf32, #tpu.memory_space<vmem>>, %arg23: memref<2x2xf32, #tpu.memory_space<vmem>>) attributes {dimension_semantics = [], scalar_prefetch = 0 : i64, scratch_operands = 0 : i64, tpu.core_type = #tpu.core_type<tc>} {
    %c0 = arith.constant 0 : index
    %c0_0 = arith.constant 0 : index
    %c0_1 = arith.constant 0 : index
    %0 = vector.load %arg1[%c0, %c0_0, %c0_1] : memref<2x1x8xf32, #tpu.memory_space<vmem>>, vector<2x1x8xf32>
    %c0_2 = arith.constant 0 : index
    %c0_3 = arith.constant 0 : index
    %1 = vector.load %arg0[%c0_2, %c0_3] : memref<16x32xf32, #tpu.memory_space<vmem>>, vector<16x32xf32>
    %c0_4 = arith.constant 0 : index
    %c0_5 = arith.constant 0 : index
    %2 = vector.load %arg2[%c0_4, %c0_5] : memref<1x32xf32, #tpu.memory_space<vmem>>, vector<1x32xf32>
    %c0_6 = arith.constant 0 : index
    %c0_7 = arith.constant 0 : index
    %3 = vector.load %arg3[%c0_6, %c0_7] : memref<1x32xf32, #tpu.memory_space<vmem>>, vector<1x32xf32>
    %cst = arith.constant dense<0.000000e+00> : vector<16xf32>
    %4 = vector.multi_reduction <add>, %1, %cst [1] : vector<16x32xf32> to vector<16xf32>
    %5 = vector.shape_cast %4 : vector<16xf32> to vector<16x1xf32>
    %cst_8 = arith.constant 3.200000e+01 : f32
    %6 = vector.broadcast %cst_8 : f32 to vector<16x1xf32>
    %7 = arith.divf %5, %6 : vector<16x1xf32>
    %8 = vector.broadcast %7 : vector<16x1xf32> to vector<16x32xf32>
    %9 = arith.subf %1, %8 : vector<16x32xf32>
    %10 = arith.mulf %9, %9 : vector<16x32xf32>
    %cst_9 = arith.constant dense<0.000000e+00> : vector<16xf32>
    %11 = vector.multi_reduction <add>, %10, %cst_9 [1] : vector<16x32xf32> to vector<16xf32>
    %12 = vector.shape_cast %11 : vector<16xf32> to vector<16x1xf32>
    %cst_10 = arith.constant 3.200000e+01 : f32
    %13 = vector.broadcast %cst_10 : f32 to vector<16x1xf32>
    %14 = arith.divf %12, %13 : vector<16x1xf32>
    %15 = vector.broadcast %7 : vector<16x1xf32> to vector<16x32xf32>
    %16 = arith.subf %1, %15 : vector<16x32xf32>
    %cst_11 = arith.constant 9.99999996E-13 : f32
    %17 = vector.broadcast %cst_11 : f32 to vector<16x1xf32>
    %18 = arith.addf %14, %17 : vector<16x1xf32>
    %19 = math.rsqrt %18 : vector<16x1xf32>
    %20 = vector.broadcast %19 : vector<16x1xf32> to vector<16x32xf32>
    %21 = arith.mulf %16, %20 : vector<16x32xf32>
    %22 = vector.broadcast %2 : vector<1x32xf32> to vector<16x32xf32>
    %23 = arith.mulf %21, %22 : vector<16x32xf32>
    %24 = vector.broadcast %3 : vector<1x32xf32> to vector<16x32xf32>
    %25 = arith.addf %23, %24 : vector<16x32xf32>
    %c0_12 = arith.constant 0 : index
    %c0_13 = arith.constant 0 : index
    %c0_14 = arith.constant 0 : index
    %26 = vector.load %arg20[%c0_12, %c0_13, %c0_14] : memref<3x16x32xf32, #tpu.memory_space<vmem>>, vector<1x16x32xf32>
    %27 = vector.shape_cast %26 : vector<1x16x32xf32> to vector<16x32xf32>
    %28 = vector.shape_cast %25 : vector<16x32xf32> to vector<1x16x32xf32>
    tpu.vector_store %arg20[%c0_12, %c0_13, %c0_14], %28 {strides = array<i32>} : memref<3x16x32xf32, #tpu.memory_space<vmem>>, vector<1x16x32xf32>,
    %c0_15 = arith.constant 0 : index
    %c0_16 = arith.constant 0 : index
    %c0_17 = arith.constant 0 : index
    %29 = vector.load %arg4[%c0_15, %c0_16, %c0_17] : memref<2x32x96xf32, #tpu.memory_space<vmem>>, vector<1x32x96xf32>
    %30 = vector.shape_cast %29 : vector<1x32x96xf32> to vector<32x96xf32>
    %cst_18 = arith.constant dense<0.000000e+00> : vector<16x96xf32>
    %31 = tpu.matmul %25, %30, %cst_18 {dimension_numbers = #tpu.dot_dimension_numbers<[1], [0], [0], [1], [0, 0, 1, 1], [], []>} : vector<16x32xf32>, vector<32x96xf32>, vector<16x96xf32> -> vector<16x96xf32>
    %c0_19 = arith.constant 0 : index
    %c0_20 = arith.constant 0 : index
    %c0_21 = arith.constant 0 : index
    %32 = vector.load %arg5[%c0_19, %c0_20, %c0_21] : memref<2x1x96xf32, #tpu.memory_space<vmem>>, vector<1x1x96xf32>
    %33 = vector.shape_cast %32 : vector<1x1x96xf32> to vector<1x96xf32>
    %34 = vector.broadcast %33 : vector<1x96xf32> to vector<16x96xf32>
    %35 = arith.addf %31, %34 : vector<16x96xf32>
    %36 = vector.extract_strided_slice %35 {offsets = [0, 0], sizes = [16, 8], strides = [1, 1]} : vector<16x96xf32> to vector<16x8xf32>
    %37 = vector.shape_cast %36 : vector<16x8xf32> to vector<2x8x8xf32>
    %38 = vector.extract_strided_slice %35 {offsets = [0, 32], sizes = [16, 8], strides = [1, 1]} : vector<16x96xf32> to vector<16x8xf32>
    %39 = vector.shape_cast %38 : vector<16x8xf32> to vector<2x8x8xf32>
    %40 = vector.extract_strided_slice %35 {offsets = [0, 64], sizes = [16, 8], strides = [1, 1]} : vector<16x96xf32> to vector<16x8xf32>
    %41 = vector.shape_cast %40 : vector<16x8xf32> to vector<2x8x8xf32>
    "tpu.trace_start"() <{level = 10 : i32, message = "bqd,bkd->bqk"}> : () -> ()
    %cst_22 = arith.constant dense<0.000000e+00> : vector<2x8x8xf32>
    %42 = tpu.matmul %37, %39, %cst_22 {dimension_numbers = #tpu.dot_dimension_numbers<[2], [2], [1], [1], [0, 0, 0, 1, 1, 1], [0], [0]>} : vector<2x8x8xf32>, vector<2x8x8xf32>, vector<2x8x8xf32> -> vector<2x8x8xf32>
    "tpu.trace_stop"() : () -> ()
    %cst_23 = arith.constant 0.353553385 : f32
    %43 = vector.broadcast %cst_23 : f32 to vector<2x8x8xf32>
    %44 = arith.mulf %42, %43 : vector<2x8x8xf32>
    %45 = vector.broadcast %0 : vector<2x1x8xf32> to vector<2x8x8xf32>
    %46 = arith.addf %44, %45 : vector<2x8x8xf32>
    %cst_24 = arith.constant dense<0xFF800000> : vector<2x8xf32>
    %47 = vector.multi_reduction <maximumf>, %46, %cst_24 [2] : vector<2x8x8xf32> to vector<2x8xf32>
    %48 = vector.shape_cast %47 : vector<2x8xf32> to vector<2x8x1xf32>
    %49 = vector.broadcast %48 : vector<2x8x1xf32> to vector<2x8x8xf32>
    %50 = arith.subf %46, %49 : vector<2x8x8xf32>
    %51 = math.exp %50 : vector<2x8x8xf32>
    %cst_25 = arith.constant dense<0.000000e+00> : vector<2x8xf32>
    %52 = vector.multi_reduction <add>, %51, %cst_25 [2] : vector<2x8x8xf32> to vector<2x8xf32>
    %53 = vector.shape_cast %52 : vector<2x8xf32> to vector<2x8x1xf32>
    %54 = vector.broadcast %53 : vector<2x8x1xf32> to vector<2x8x8xf32>
    %55 = arith.divf %51, %54 : vector<2x8x8xf32>
    %c0_26 = arith.constant 0 : index
    %c0_27 = arith.constant 0 : index
    %c0_28 = arith.constant 0 : index
    %c0_29 = arith.constant 0 : index
    %c0_30 = arith.constant 0 : index
    %56 = vector.load %arg21[%c0_26, %c0_27, %c0_28, %c0_29, %c0_30] : memref<2x4x2x8x8xf32, #tpu.memory_space<vmem>>, vector<1x1x2x8x8xf32>
    %57 = vector.shape_cast %56 : vector<1x1x2x8x8xf32> to vector<2x8x8xf32>
    %58 = vector.shape_cast %55 : vector<2x8x8xf32> to vector<1x1x2x8x8xf32>
    tpu.vector_store %arg21[%c0_26, %c0_27, %c0_28, %c0_29, %c0_30], %58 {strides = array<i32>} : memref<2x4x2x8x8xf32, #tpu.memory_space<vmem>>, vector<1x1x2x8x8xf32>,
    "tpu.trace_start"() <{level = 10 : i32, message = "bqk,bkd->bqd"}> : () -> ()
    %cst_31 = arith.constant dense<0.000000e+00> : vector<2x8x8xf32>
    %59 = tpu.matmul %55, %41, %cst_31 {dimension_numbers = #tpu.dot_dimension_numbers<[2], [1], [1], [2], [0, 0, 0, 1, 1, 2], [0], [0]>} : vector<2x8x8xf32>, vector<2x8x8xf32>, vector<2x8x8xf32> -> vector<2x8x8xf32>
    "tpu.trace_stop"() : () -> ()
    %60 = vector.shape_cast %59 : vector<2x8x8xf32> to vector<16x8xf32>
    %61 = vector.extract_strided_slice %35 {offsets = [0, 8], sizes = [16, 8], strides = [1, 1]} : vector<16x96xf32> to vector<16x8xf32>
    %62 = vector.shape_cast %61 : vector<16x8xf32> to vector<2x8x8xf32>
    %63 = vector.extract_strided_slice %35 {offsets = [0, 40], sizes = [16, 8], strides = [1, 1]} : vector<16x96xf32> to vector<16x8xf32>
    %64 = vector.shape_cast %63 : vector<16x8xf32> to vector<2x8x8xf32>
    %65 = vector.extract_strided_slice %35 {offsets = [0, 72], sizes = [16, 8], strides = [1, 1]} : vector<16x96xf32> to vector<16x8xf32>
    %66 = vector.shape_cast %65 : vector<16x8xf32> to vector<2x8x8xf32>
    "tpu.trace_start"() <{level = 10 : i32, message = "bqd,bkd->bqk"}> : () -> ()
    %cst_32 = arith.constant dense<0.000000e+00> : vector<2x8x8xf32>
    %67 = tpu.matmul %62, %64, %cst_32 {dimension_numbers = #tpu.dot_dimension_numbers<[2], [2], [1], [1], [0, 0, 0, 1, 1, 1], [0], [0]>} : vector<2x8x8xf32>, vector<2x8x8xf32>, vector<2x8x8xf32> -> vector<2x8x8xf32>
    "tpu.trace_stop"() : () -> ()
    %cst_33 = arith.constant 0.353553385 : f32
    %68 = vector.broadcast %cst_33 : f32 to vector<2x8x8xf32>
    %69 = arith.mulf %67, %68 : vector<2x8x8xf32>
    %70 = vector.broadcast %0 : vector<2x1x8xf32> to vector<2x8x8xf32>
    %71 = arith.addf %69, %70 : vector<2x8x8xf32>
    %cst_34 = arith.constant dense<0xFF800000> : vector<2x8xf32>
    %72 = vector.multi_reduction <maximumf>, %71, %cst_34 [2] : vector<2x8x8xf32> to vector<2x8xf32>
    %73 = vector.shape_cast %72 : vector<2x8xf32> to vector<2x8x1xf32>
    %74 = vector.broadcast %73 : vector<2x8x1xf32> to vector<2x8x8xf32>
    %75 = arith.subf %71, %74 : vector<2x8x8xf32>
    %76 = math.exp %75 : vector<2x8x8xf32>
    %cst_35 = arith.constant dense<0.000000e+00> : vector<2x8xf32>
    %77 = vector.multi_reduction <add>, %76, %cst_35 [2] : vector<2x8x8xf32> to vector<2x8xf32>
    %78 = vector.shape_cast %77 : vector<2x8xf32> to vector<2x8x1xf32>
    %79 = vector.broadcast %78 : vector<2x8x1xf32> to vector<2x8x8xf32>
    %80 = arith.divf %76, %79 : vector<2x8x8xf32>
    %c0_36 = arith.constant 0 : index
    %c1 = arith.constant 1 : index
    %c0_37 = arith.constant 0 : index
    %c0_38 = arith.constant 0 : index
    %c0_39 = arith.constant 0 : index
    %81 = vector.load %arg21[%c0_36, %c1, %c0_37, %c0_38, %c0_39] : memref<2x4x2x8x8xf32, #tpu.memory_space<vmem>>, vector<1x1x2x8x8xf32>
    %82 = vector.shape_cast %81 : vector<1x1x2x8x8xf32> to vector<2x8x8xf32>
    %83 = vector.shape_cast %80 : vector<2x8x8xf32> to vector<1x1x2x8x8xf32>
    tpu.vector_store %arg21[%c0_36, %c1, %c0_37, %c0_38, %c0_39], %83 {strides = array<i32>} : memref<2x4x2x8x8xf32, #tpu.memory_space<vmem>>, vector<1x1x2x8x8xf32>,
    "tpu.trace_start"() <{level = 10 : i32, message = "bqk,bkd->bqd"}> : () -> ()
    %cst_40 = arith.constant dense<0.000000e+00> : vector<2x8x8xf32>
    %84 = tpu.matmul %80, %66, %cst_40 {dimension_numbers = #tpu.dot_dimension_numbers<[2], [1], [1], [2], [0, 0, 0, 1, 1, 2], [0], [0]>} : vector<2x8x8xf32>, vector<2x8x8xf32>, vector<2x8x8xf32> -> vector<2x8x8xf32>
    "tpu.trace_stop"() : () -> ()
    %85 = vector.shape_cast %84 : vector<2x8x8xf32> to vector<16x8xf32>
    %86 = vector.extract_strided_slice %35 {offsets = [0, 16], sizes = [16, 8], strides = [1, 1]} : vector<16x96xf32> to vector<16x8xf32>
    %87 = vector.shape_cast %86 : vector<16x8xf32> to vector<2x8x8xf32>
    %88 = vector.extract_strided_slice %35 {offsets = [0, 48], sizes = [16, 8], strides = [1, 1]} : vector<16x96xf32> to vector<16x8xf32>
    %89 = vector.shape_cast %88 : vector<16x8xf32> to vector<2x8x8xf32>
    %90 = vector.extract_strided_slice %35 {offsets = [0, 80], sizes = [16, 8], strides = [1, 1]} : vector<16x96xf32> to vector<16x8xf32>
    %91 = vector.shape_cast %90 : vector<16x8xf32> to vector<2x8x8xf32>
    "tpu.trace_start"() <{level = 10 : i32, message = "bqd,bkd->bqk"}> : () -> ()
    %cst_41 = arith.constant dense<0.000000e+00> : vector<2x8x8xf32>
    %92 = tpu.matmul %87, %89, %cst_41 {dimension_numbers = #tpu.dot_dimension_numbers<[2], [2], [1], [1], [0, 0, 0, 1, 1, 1], [0], [0]>} : vector<2x8x8xf32>, vector<2x8x8xf32>, vector<2x8x8xf32> -> vector<2x8x8xf32>
    "tpu.trace_stop"() : () -> ()
    %cst_42 = arith.constant 0.353553385 : f32
    %93 = vector.broadcast %cst_42 : f32 to vector<2x8x8xf32>
    %94 = arith.mulf %92, %93 : vector<2x8x8xf32>
    %95 = vector.broadcast %0 : vector<2x1x8xf32> to vector<2x8x8xf32>
    %96 = arith.addf %94, %95 : vector<2x8x8xf32>
    %cst_43 = arith.constant dense<0xFF800000> : vector<2x8xf32>
    %97 = vector.multi_reduction <maximumf>, %96, %cst_43 [2] : vector<2x8x8xf32> to vector<2x8xf32>
    %98 = vector.shape_cast %97 : vector<2x8xf32> to vector<2x8x1xf32>
    %99 = vector.broadcast %98 : vector<2x8x1xf32> to vector<2x8x8xf32>
    %100 = arith.subf %96, %99 : vector<2x8x8xf32>
    %101 = math.exp %100 : vector<2x8x8xf32>
    %cst_44 = arith.constant dense<0.000000e+00> : vector<2x8xf32>
    %102 = vector.multi_reduction <add>, %101, %cst_44 [2] : vector<2x8x8xf32> to vector<2x8xf32>
    %103 = vector.shape_cast %102 : vector<2x8xf32> to vector<2x8x1xf32>
    %104 = vector.broadcast %103 : vector<2x8x1xf32> to vector<2x8x8xf32>
    %105 = arith.divf %101, %104 : vector<2x8x8xf32>
    %c0_45 = arith.constant 0 : index
    %c2 = arith.constant 2 : index
    %c0_46 = arith.constant 0 : index
    %c0_47 = arith.constant 0 : index
    %c0_48 = arith.constant 0 : index
    %106 = vector.load %arg21[%c0_45, %c2, %c0_46, %c0_47, %c0_48] : memref<2x4x2x8x8xf32, #tpu.memory_space<vmem>>, vector<1x1x2x8x8xf32>
    %107 = vector.shape_cast %106 : vector<1x1x2x8x8xf32> to vector<2x8x8xf32>
    %108 = vector.shape_cast %105 : vector<2x8x8xf32> to vector<1x1x2x8x8xf32>
    tpu.vector_store %arg21[%c0_45, %c2, %c0_46, %c0_47, %c0_48], %108 {strides = array<i32>} : memref<2x4x2x8x8xf32, #tpu.memory_space<vmem>>, vector<1x1x2x8x8xf32>,
    "tpu.trace_start"() <{level = 10 : i32, message = "bqk,bkd->bqd"}> : () -> ()
    %cst_49 = arith.constant dense<0.000000e+00> : vector<2x8x8xf32>
    %109 = tpu.matmul %105, %91, %cst_49 {dimension_numbers = #tpu.dot_dimension_numbers<[2], [1], [1], [2], [0, 0, 0, 1, 1, 2], [0], [0]>} : vector<2x8x8xf32>, vector<2x8x8xf32>, vector<2x8x8xf32> -> vector<2x8x8xf32>
    "tpu.trace_stop"() : () -> ()
    %110 = vector.shape_cast %109 : vector<2x8x8xf32> to vector<16x8xf32>
    %111 = vector.extract_strided_slice %35 {offsets = [0, 24], sizes = [16, 8], strides = [1, 1]} : vector<16x96xf32> to vector<16x8xf32>
    %112 = vector.shape_cast %111 : vector<16x8xf32> to vector<2x8x8xf32>
    %113 = vector.extract_strided_slice %35 {offsets = [0, 56], sizes = [16, 8], strides = [1, 1]} : vector<16x96xf32> to vector<16x8xf32>
    %114 = vector.shape_cast %113 : vector<16x8xf32> to vector<2x8x8xf32>
    %115 = vector.extract_strided_slice %35 {offsets = [0, 88], sizes = [16, 8], strides = [1, 1]} : vector<16x96xf32> to vector<16x8xf32>
    %116 = vector.shape_cast %115 : vector<16x8xf32> to vector<2x8x8xf32>
    "tpu.trace_start"() <{level = 10 : i32, message = "bqd,bkd->bqk"}> : () -> ()
    %cst_50 = arith.constant dense<0.000000e+00> : vector<2x8x8xf32>
    %117 = tpu.matmul %112, %114, %cst_50 {dimension_numbers = #tpu.dot_dimension_numbers<[2], [2], [1], [1], [0, 0, 0, 1, 1, 1], [0], [0]>} : vector<2x8x8xf32>, vector<2x8x8xf32>, vector<2x8x8xf32> -> vector<2x8x8xf32>
    "tpu.trace_stop"() : () -> ()
    %cst_51 = arith.constant 0.353553385 : f32
    %118 = vector.broadcast %cst_51 : f32 to vector<2x8x8xf32>
    %119 = arith.mulf %117, %118 : vector<2x8x8xf32>
    %120 = vector.broadcast %0 : vector<2x1x8xf32> to vector<2x8x8xf32>
    %121 = arith.addf %119, %120 : vector<2x8x8xf32>
    %cst_52 = arith.constant dense<0xFF800000> : vector<2x8xf32>
    %122 = vector.multi_reduction <maximumf>, %121, %cst_52 [2] : vector<2x8x8xf32> to vector<2x8xf32>
    %123 = vector.shape_cast %122 : vector<2x8xf32> to vector<2x8x1xf32>
    %124 = vector.broadcast %123 : vector<2x8x1xf32> to vector<2x8x8xf32>
    %125 = arith.subf %121, %124 : vector<2x8x8xf32>
    %126 = math.exp %125 : vector<2x8x8xf32>
    %cst_53 = arith.constant dense<0.000000e+00> : vector<2x8xf32>
    %127 = vector.multi_reduction <add>, %126, %cst_53 [2] : vector<2x8x8xf32> to vector<2x8xf32>
    %128 = vector.shape_cast %127 : vector<2x8xf32> to vector<2x8x1xf32>
    %129 = vector.broadcast %128 : vector<2x8x1xf32> to vector<2x8x8xf32>
    %130 = arith.divf %126, %129 : vector<2x8x8xf32>
    %c0_54 = arith.constant 0 : index
    %c3 = arith.constant 3 : index
    %c0_55 = arith.constant 0 : index
    %c0_56 = arith.constant 0 : index
    %c0_57 = arith.constant 0 : index
    %131 = vector.load %arg21[%c0_54, %c3, %c0_55, %c0_56, %c0_57] : memref<2x4x2x8x8xf32, #tpu.memory_space<vmem>>, vector<1x1x2x8x8xf32>
    %132 = vector.shape_cast %131 : vector<1x1x2x8x8xf32> to vector<2x8x8xf32>
    %133 = vector.shape_cast %130 : vector<2x8x8xf32> to vector<1x1x2x8x8xf32>
    tpu.vector_store %arg21[%c0_54, %c3, %c0_55, %c0_56, %c0_57], %133 {strides = array<i32>} : memref<2x4x2x8x8xf32, #tpu.memory_space<vmem>>, vector<1x1x2x8x8xf32>,
    "tpu.trace_start"() <{level = 10 : i32, message = "bqk,bkd->bqd"}> : () -> ()
    %cst_58 = arith.constant dense<0.000000e+00> : vector<2x8x8xf32>
    %134 = tpu.matmul %130, %116, %cst_58 {dimension_numbers = #tpu.dot_dimension_numbers<[2], [1], [1], [2], [0, 0, 0, 1, 1, 2], [0], [0]>} : vector<2x8x8xf32>, vector<2x8x8xf32>, vector<2x8x8xf32> -> vector<2x8x8xf32>
    "tpu.trace_stop"() : () -> ()
    %135 = vector.shape_cast %134 : vector<2x8x8xf32> to vector<16x8xf32>
    %136 = tpu.concatenate %60, %85, %110, %135 in 1 : vector<16x8xf32>, vector<16x8xf32>, vector<16x8xf32>, vector<16x8xf32> -> vector<16x32xf32>
    %c0_59 = arith.constant 0 : index
    %c0_60 = arith.constant 0 : index
    %c0_61 = arith.constant 0 : index
    %137 = vector.load %arg6[%c0_59, %c0_60, %c0_61] : memref<2x32x32xf32, #tpu.memory_space<vmem>>, vector<1x32x32xf32>
    %138 = vector.shape_cast %137 : vector<1x32x32xf32> to vector<32x32xf32>
    %cst_62 = arith.constant dense<0.000000e+00> : vector<16x32xf32>
    %139 = tpu.matmul %136, %138, %cst_62 {dimension_numbers = #tpu.dot_dimension_numbers<[1], [0], [0], [1], [0, 0, 1, 1], [], []>} : vector<16x32xf32>, vector<32x32xf32>, vector<16x32xf32> -> vector<16x32xf32>
    %c0_63 = arith.constant 0 : index
    %c0_64 = arith.constant 0 : index
    %c0_65 = arith.constant 0 : index
    %140 = vector.load %arg7[%c0_63, %c0_64, %c0_65] : memref<2x1x32xf32, #tpu.memory_space<vmem>>, vector<1x1x32xf32>
    %141 = vector.shape_cast %140 : vector<1x1x32xf32> to vector<1x32xf32>
    %142 = vector.broadcast %141 : vector<1x32xf32> to vector<16x32xf32>
    %143 = arith.addf %139, %142 : vector<16x32xf32>
    %144 = arith.addf %143, %25 : vector<16x32xf32>
    %c0_66 = arith.constant 0 : index
    %c0_67 = arith.constant 0 : index
    %c0_68 = arith.constant 0 : index
    %145 = vector.load %arg8[%c0_66, %c0_67, %c0_68] : memref<2x1x32xf32, #tpu.memory_space<vmem>>, vector<1x1x32xf32>
    %146 = vector.shape_cast %145 : vector<1x1x32xf32> to vector<1x32xf32>
    %c0_69 = arith.constant 0 : index
    %c0_70 = arith.constant 0 : index
    %c0_71 = arith.constant 0 : index
    %147 = vector.load %arg9[%c0_69, %c0_70, %c0_71] : memref<2x1x32xf32, #tpu.memory_space<vmem>>, vector<1x1x32xf32>
    %148 = vector.shape_cast %147 : vector<1x1x32xf32> to vector<1x32xf32>
    %cst_72 = arith.constant dense<0.000000e+00> : vector<16xf32>
    %149 = vector.multi_reduction <add>, %144, %cst_72 [1] : vector<16x32xf32> to vector<16xf32>
    %150 = vector.shape_cast %149 : vector<16xf32> to vector<16x1xf32>
    %cst_73 = arith.constant 3.200000e+01 : f32
    %151 = vector.broadcast %cst_73 : f32 to vector<16x1xf32>
    %152 = arith.divf %150, %151 : vector<16x1xf32>
    %153 = vector.broadcast %152 : vector<16x1xf32> to vector<16x32xf32>
    %154 = arith.subf %144, %153 : vector<16x32xf32>
    %155 = arith.mulf %154, %154 : vector<16x32xf32>
    %cst_74 = arith.constant dense<0.000000e+00> : vector<16xf32>
    %156 = vector.multi_reduction <add>, %155, %cst_74 [1] : vector<16x32xf32> to vector<16xf32>
    %157 = vector.shape_cast %156 : vector<16xf32> to vector<16x1xf32>
    %cst_75 = arith.constant 3.200000e+01 : f32
    %158 = vector.broadcast %cst_75 : f32 to vector<16x1xf32>
    %159 = arith.divf %157, %158 : vector<16x1xf32>
    %160 = vector.broadcast %152 : vector<16x1xf32> to vector<16x32xf32>
    %161 = arith.subf %144, %160 : vector<16x32xf32>
    %cst_76 = arith.constant 9.99999996E-13 : f32
    %162 = vector.broadcast %cst_76 : f32 to vector<16x1xf32>
    %163 = arith.addf %159, %162 : vector<16x1xf32>
    %164 = math.rsqrt %163 : vector<16x1xf32>
    %165 = vector.broadcast %164 : vector<16x1xf32> to vector<16x32xf32>
    %166 = arith.mulf %161, %165 : vector<16x32xf32>
    %167 = vector.broadcast %146 : vector<1x32xf32> to vector<16x32xf32>
    %168 = arith.mulf %166, %167 : vector<16x32xf32>
    %169 = vector.broadcast %148 : vector<1x32xf32> to vector<16x32xf32>
    %170 = arith.addf %168, %169 : vector<16x32xf32>
    %c0_77 = arith.constant 0 : index
    %c0_78 = arith.constant 0 : index
    %c0_79 = arith.constant 0 : index
    %171 = vector.load %arg10[%c0_77, %c0_78, %c0_79] : memref<2x32x64xf32, #tpu.memory_space<vmem>>, vector<1x32x64xf32>
    %172 = vector.shape_cast %171 : vector<1x32x64xf32> to vector<32x64xf32>
    %cst_80 = arith.constant dense<0.000000e+00> : vector<16x64xf32>
    %173 = tpu.matmul %170, %172, %cst_80 {dimension_numbers = #tpu.dot_dimension_numbers<[1], [0], [0], [1], [0, 0, 1, 1], [], []>} : vector<16x32xf32>, vector<32x64xf32>, vector<16x64xf32> -> vector<16x64xf32>
    %c0_81 = arith.constant 0 : index
    %c0_82 = arith.constant 0 : index
    %c0_83 = arith.constant 0 : index
    %174 = vector.load %arg11[%c0_81, %c0_82, %c0_83] : memref<2x1x64xf32, #tpu.memory_space<vmem>>, vector<1x1x64xf32>
    %175 = vector.shape_cast %174 : vector<1x1x64xf32> to vector<1x64xf32>
    %176 = vector.broadcast %175 : vector<1x64xf32> to vector<16x64xf32>
    %177 = arith.addf %173, %176 : vector<16x64xf32>
    %cst_84 = arith.constant 5.000000e-01 : f32
    %178 = vector.broadcast %cst_84 : f32 to vector<16x64xf32>
    %179 = arith.mulf %178, %177 : vector<16x64xf32>
    %cst_85 = arith.constant 4.471500e-02 : f32
    %180 = vector.broadcast %cst_85 : f32 to vector<16x64xf32>
    %181 = arith.mulf %180, %177 : vector<16x64xf32>
    %182 = arith.mulf %181, %177 : vector<16x64xf32>
    %183 = arith.mulf %182, %177 : vector<16x64xf32>
    %184 = arith.addf %177, %183 : vector<16x64xf32>
    %cst_86 = arith.constant 0.797884583 : f32
    %185 = vector.broadcast %cst_86 : f32 to vector<16x64xf32>
    %186 = arith.mulf %185, %184 : vector<16x64xf32>
    %187 = math.tanh %186 : vector<16x64xf32>
    %cst_87 = arith.constant 1.000000e+00 : f32
    %188 = vector.broadcast %cst_87 : f32 to vector<16x64xf32>
    %189 = arith.addf %188, %187 : vector<16x64xf32>
    %190 = arith.mulf %179, %189 : vector<16x64xf32>
    %c0_88 = arith.constant 0 : index
    %c0_89 = arith.constant 0 : index
    %c0_90 = arith.constant 0 : index
    %191 = vector.load %arg12[%c0_88, %c0_89, %c0_90] : memref<2x64x32xf32, #tpu.memory_space<vmem>>, vector<1x64x32xf32>
    %192 = vector.shape_cast %191 : vector<1x64x32xf32> to vector<64x32xf32>
    %cst_91 = arith.constant dense<0.000000e+00> : vector<16x32xf32>
    %193 = tpu.matmul %190, %192, %cst_91 {dimension_numbers = #tpu.dot_dimension_numbers<[1], [0], [0], [1], [0, 0, 1, 1], [], []>} : vector<16x64xf32>, vector<64x32xf32>, vector<16x32xf32> -> vector<16x32xf32>
    %c0_92 = arith.constant 0 : index
    %c0_93 = arith.constant 0 : index
    %c0_94 = arith.constant 0 : index
    %194 = vector.load %arg13[%c0_92, %c0_93, %c0_94] : memref<2x1x32xf32, #tpu.memory_space<vmem>>, vector<1x1x32xf32>
    %195 = vector.shape_cast %194 : vector<1x1x32xf32> to vector<1x32xf32>
    %196 = vector.broadcast %195 : vector<1x32xf32> to vector<16x32xf32>
    %197 = arith.addf %193, %196 : vector<16x32xf32>
    %198 = arith.addf %197, %170 : vector<16x32xf32>
    %c0_95 = arith.constant 0 : index
    %c0_96 = arith.constant 0 : index
    %c0_97 = arith.constant 0 : index
    %199 = vector.load %arg14[%c0_95, %c0_96, %c0_97] : memref<2x1x32xf32, #tpu.memory_space<vmem>>, vector<1x1x32xf32>
    %200 = vector.shape_cast %199 : vector<1x1x32xf32> to vector<1x32xf32>
    %c0_98 = arith.constant 0 : index
    %c0_99 = arith.constant 0 : index
    %c0_100 = arith.constant 0 : index
    %201 = vector.load %arg15[%c0_98, %c0_99, %c0_100] : memref<2x1x32xf32, #tpu.memory_space<vmem>>, vector<1x1x32xf32>
    %202 = vector.shape_cast %201 : vector<1x1x32xf32> to vector<1x32xf32>
    %cst_101 = arith.constant dense<0.000000e+00> : vector<16xf32>
    %203 = vector.multi_reduction <add>, %198, %cst_101 [1] : vector<16x32xf32> to vector<16xf32>
    %204 = vector.shape_cast %203 : vector<16xf32> to vector<16x1xf32>
    %cst_102 = arith.constant 3.200000e+01 : f32
    %205 = vector.broadcast %cst_102 : f32 to vector<16x1xf32>
    %206 = arith.divf %204, %205 : vector<16x1xf32>
    %207 = vector.broadcast %206 : vector<16x1xf32> to vector<16x32xf32>
    %208 = arith.subf %198, %207 : vector<16x32xf32>
    %209 = arith.mulf %208, %208 : vector<16x32xf32>
    %cst_103 = arith.constant dense<0.000000e+00> : vector<16xf32>
    %210 = vector.multi_reduction <add>, %209, %cst_103 [1] : vector<16x32xf32> to vector<16xf32>
    %211 = vector.shape_cast %210 : vector<16xf32> to vector<16x1xf32>
    %cst_104 = arith.constant 3.200000e+01 : f32
    %212 = vector.broadcast %cst_104 : f32 to vector<16x1xf32>
    %213 = arith.divf %211, %212 : vector<16x1xf32>
    %214 = vector.broadcast %206 : vector<16x1xf32> to vector<16x32xf32>
    %215 = arith.subf %198, %214 : vector<16x32xf32>
    %cst_105 = arith.constant 9.99999996E-13 : f32
    %216 = vector.broadcast %cst_105 : f32 to vector<16x1xf32>
    %217 = arith.addf %213, %216 : vector<16x1xf32>
    %218 = math.rsqrt %217 : vector<16x1xf32>
    %219 = vector.broadcast %218 : vector<16x1xf32> to vector<16x32xf32>
    %220 = arith.mulf %215, %219 : vector<16x32xf32>
    %221 = vector.broadcast %200 : vector<1x32xf32> to vector<16x32xf32>
    %222 = arith.mulf %220, %221 : vector<16x32xf32>
    %223 = vector.broadcast %202 : vector<1x32xf32> to vector<16x32xf32>
    %224 = arith.addf %222, %223 : vector<16x32xf32>
    %c1_106 = arith.constant 1 : index
    %c0_107 = arith.constant 0 : index
    %c0_108 = arith.constant 0 : index
    %225 = vector.load %arg20[%c1_106, %c0_107, %c0_108] : memref<3x16x32xf32, #tpu.memory_space<vmem>>, vector<1x16x32xf32>
    %226 = vector.shape_cast %225 : vector<1x16x32xf32> to vector<16x32xf32>
    %227 = vector.shape_cast %224 : vector<16x32xf32> to vector<1x16x32xf32>
    tpu.vector_store %arg20[%c1_106, %c0_107, %c0_108], %227 {strides = array<i32>} : memref<3x16x32xf32, #tpu.memory_space<vmem>>, vector<1x16x32xf32>,
    %c1_109 = arith.constant 1 : index
    %c0_110 = arith.constant 0 : index
    %c0_111 = arith.constant 0 : index
    %228 = vector.load %arg4[%c1_109, %c0_110, %c0_111] : memref<2x32x96xf32, #tpu.memory_space<vmem>>, vector<1x32x96xf32>
    %229 = vector.shape_cast %228 : vector<1x32x96xf32> to vector<32x96xf32>
    %cst_112 = arith.constant dense<0.000000e+00> : vector<16x96xf32>
    %230 = tpu.matmul %224, %229, %cst_112 {dimension_numbers = #tpu.dot_dimension_numbers<[1], [0], [0], [1], [0, 0, 1, 1], [], []>} : vector<16x32xf32>, vector<32x96xf32>, vector<16x96xf32> -> vector<16x96xf32>
    %c1_113 = arith.constant 1 : index
    %c0_114 = arith.constant 0 : index
    %c0_115 = arith.constant 0 : index
    %231 = vector.load %arg5[%c1_113, %c0_114, %c0_115] : memref<2x1x96xf32, #tpu.memory_space<vmem>>, vector<1x1x96xf32>
    %232 = vector.shape_cast %231 : vector<1x1x96xf32> to vector<1x96xf32>
    %233 = vector.broadcast %232 : vector<1x96xf32> to vector<16x96xf32>
    %234 = arith.addf %230, %233 : vector<16x96xf32>
    %235 = vector.extract_strided_slice %234 {offsets = [0, 0], sizes = [16, 8], strides = [1, 1]} : vector<16x96xf32> to vector<16x8xf32>
    %236 = vector.shape_cast %235 : vector<16x8xf32> to vector<2x8x8xf32>
    %237 = vector.extract_strided_slice %234 {offsets = [0, 32], sizes = [16, 8], strides = [1, 1]} : vector<16x96xf32> to vector<16x8xf32>
    %238 = vector.shape_cast %237 : vector<16x8xf32> to vector<2x8x8xf32>
    %239 = vector.extract_strided_slice %234 {offsets = [0, 64], sizes = [16, 8], strides = [1, 1]} : vector<16x96xf32> to vector<16x8xf32>
    %240 = vector.shape_cast %239 : vector<16x8xf32> to vector<2x8x8xf32>
    "tpu.trace_start"() <{level = 10 : i32, message = "bqd,bkd->bqk"}> : () -> ()
    %cst_116 = arith.constant dense<0.000000e+00> : vector<2x8x8xf32>
    %241 = tpu.matmul %236, %238, %cst_116 {dimension_numbers = #tpu.dot_dimension_numbers<[2], [2], [1], [1], [0, 0, 0, 1, 1, 1], [0], [0]>} : vector<2x8x8xf32>, vector<2x8x8xf32>, vector<2x8x8xf32> -> vector<2x8x8xf32>
    "tpu.trace_stop"() : () -> ()
    %cst_117 = arith.constant 0.353553385 : f32
    %242 = vector.broadcast %cst_117 : f32 to vector<2x8x8xf32>
    %243 = arith.mulf %241, %242 : vector<2x8x8xf32>
    %244 = vector.broadcast %0 : vector<2x1x8xf32> to vector<2x8x8xf32>
    %245 = arith.addf %243, %244 : vector<2x8x8xf32>
    %cst_118 = arith.constant dense<0xFF800000> : vector<2x8xf32>
    %246 = vector.multi_reduction <maximumf>, %245, %cst_118 [2] : vector<2x8x8xf32> to vector<2x8xf32>
    %247 = vector.shape_cast %246 : vector<2x8xf32> to vector<2x8x1xf32>
    %248 = vector.broadcast %247 : vector<2x8x1xf32> to vector<2x8x8xf32>
    %249 = arith.subf %245, %248 : vector<2x8x8xf32>
    %250 = math.exp %249 : vector<2x8x8xf32>
    %cst_119 = arith.constant dense<0.000000e+00> : vector<2x8xf32>
    %251 = vector.multi_reduction <add>, %250, %cst_119 [2] : vector<2x8x8xf32> to vector<2x8xf32>
    %252 = vector.shape_cast %251 : vector<2x8xf32> to vector<2x8x1xf32>
    %253 = vector.broadcast %252 : vector<2x8x1xf32> to vector<2x8x8xf32>
    %254 = arith.divf %250, %253 : vector<2x8x8xf32>
    %c1_120 = arith.constant 1 : index
    %c0_121 = arith.constant 0 : index
    %c0_122 = arith.constant 0 : index
    %c0_123 = arith.constant 0 : index
    %c0_124 = arith.constant 0 : index
    %255 = vector.load %arg21[%c1_120, %c0_121, %c0_122, %c0_123, %c0_124] : memref<2x4x2x8x8xf32, #tpu.memory_space<vmem>>, vector<1x1x2x8x8xf32>
    %256 = vector.shape_cast %255 : vector<1x1x2x8x8xf32> to vector<2x8x8xf32>
    %257 = vector.shape_cast %254 : vector<2x8x8xf32> to vector<1x1x2x8x8xf32>
    tpu.vector_store %arg21[%c1_120, %c0_121, %c0_122, %c0_123, %c0_124], %257 {strides = array<i32>} : memref<2x4x2x8x8xf32, #tpu.memory_space<vmem>>, vector<1x1x2x8x8xf32>,
    "tpu.trace_start"() <{level = 10 : i32, message = "bqk,bkd->bqd"}> : () -> ()
    %cst_125 = arith.constant dense<0.000000e+00> : vector<2x8x8xf32>
    %258 = tpu.matmul %254, %240, %cst_125 {dimension_numbers = #tpu.dot_dimension_numbers<[2], [1], [1], [2], [0, 0, 0, 1, 1, 2], [0], [0]>} : vector<2x8x8xf32>, vector<2x8x8xf32>, vector<2x8x8xf32> -> vector<2x8x8xf32>
    "tpu.trace_stop"() : () -> ()
    %259 = vector.shape_cast %258 : vector<2x8x8xf32> to vector<16x8xf32>
    %260 = vector.extract_strided_slice %234 {offsets = [0, 8], sizes = [16, 8], strides = [1, 1]} : vector<16x96xf32> to vector<16x8xf32>
    %261 = vector.shape_cast %260 : vector<16x8xf32> to vector<2x8x8xf32>
    %262 = vector.extract_strided_slice %234 {offsets = [0, 40], sizes = [16, 8], strides = [1, 1]} : vector<16x96xf32> to vector<16x8xf32>
    %263 = vector.shape_cast %262 : vector<16x8xf32> to vector<2x8x8xf32>
    %264 = vector.extract_strided_slice %234 {offsets = [0, 72], sizes = [16, 8], strides = [1, 1]} : vector<16x96xf32> to vector<16x8xf32>
    %265 = vector.shape_cast %264 : vector<16x8xf32> to vector<2x8x8xf32>
    "tpu.trace_start"() <{level = 10 : i32, message = "bqd,bkd->bqk"}> : () -> ()
    %cst_126 = arith.constant dense<0.000000e+00> : vector<2x8x8xf32>
    %266 = tpu.matmul %261, %263, %cst_126 {dimension_numbers = #tpu.dot_dimension_numbers<[2], [2], [1], [1], [0, 0, 0, 1, 1, 1], [0], [0]>} : vector<2x8x8xf32>, vector<2x8x8xf32>, vector<2x8x8xf32> -> vector<2x8x8xf32>
    "tpu.trace_stop"() : () -> ()
    %cst_127 = arith.constant 0.353553385 : f32
    %267 = vector.broadcast %cst_127 : f32 to vector<2x8x8xf32>
    %268 = arith.mulf %266, %267 : vector<2x8x8xf32>
    %269 = vector.broadcast %0 : vector<2x1x8xf32> to vector<2x8x8xf32>
    %270 = arith.addf %268, %269 : vector<2x8x8xf32>
    %cst_128 = arith.constant dense<0xFF800000> : vector<2x8xf32>
    %271 = vector.multi_reduction <maximumf>, %270, %cst_128 [2] : vector<2x8x8xf32> to vector<2x8xf32>
    %272 = vector.shape_cast %271 : vector<2x8xf32> to vector<2x8x1xf32>
    %273 = vector.broadcast %272 : vector<2x8x1xf32> to vector<2x8x8xf32>
    %274 = arith.subf %270, %273 : vector<2x8x8xf32>
    %275 = math.exp %274 : vector<2x8x8xf32>
    %cst_129 = arith.constant dense<0.000000e+00> : vector<2x8xf32>
    %276 = vector.multi_reduction <add>, %275, %cst_129 [2] : vector<2x8x8xf32> to vector<2x8xf32>
    %277 = vector.shape_cast %276 : vector<2x8xf32> to vector<2x8x1xf32>
    %278 = vector.broadcast %277 : vector<2x8x1xf32> to vector<2x8x8xf32>
    %279 = arith.divf %275, %278 : vector<2x8x8xf32>
    %c1_130 = arith.constant 1 : index
    %c1_131 = arith.constant 1 : index
    %c0_132 = arith.constant 0 : index
    %c0_133 = arith.constant 0 : index
    %c0_134 = arith.constant 0 : index
    %280 = vector.load %arg21[%c1_130, %c1_131, %c0_132, %c0_133, %c0_134] : memref<2x4x2x8x8xf32, #tpu.memory_space<vmem>>, vector<1x1x2x8x8xf32>
    %281 = vector.shape_cast %280 : vector<1x1x2x8x8xf32> to vector<2x8x8xf32>
    %282 = vector.shape_cast %279 : vector<2x8x8xf32> to vector<1x1x2x8x8xf32>
    tpu.vector_store %arg21[%c1_130, %c1_131, %c0_132, %c0_133, %c0_134], %282 {strides = array<i32>} : memref<2x4x2x8x8xf32, #tpu.memory_space<vmem>>, vector<1x1x2x8x8xf32>,
    "tpu.trace_start"() <{level = 10 : i32, message = "bqk,bkd->bqd"}> : () -> ()
    %cst_135 = arith.constant dense<0.000000e+00> : vector<2x8x8xf32>
    %283 = tpu.matmul %279, %265, %cst_135 {dimension_numbers = #tpu.dot_dimension_numbers<[2], [1], [1], [2], [0, 0, 0, 1, 1, 2], [0], [0]>} : vector<2x8x8xf32>, vector<2x8x8xf32>, vector<2x8x8xf32> -> vector<2x8x8xf32>
    "tpu.trace_stop"() : () -> ()
    %284 = vector.shape_cast %283 : vector<2x8x8xf32> to vector<16x8xf32>
    %285 = vector.extract_strided_slice %234 {offsets = [0, 16], sizes = [16, 8], strides = [1, 1]} : vector<16x96xf32> to vector<16x8xf32>
    %286 = vector.shape_cast %285 : vector<16x8xf32> to vector<2x8x8xf32>
    %287 = vector.extract_strided_slice %234 {offsets = [0, 48], sizes = [16, 8], strides = [1, 1]} : vector<16x96xf32> to vector<16x8xf32>
    %288 = vector.shape_cast %287 : vector<16x8xf32> to vector<2x8x8xf32>
    %289 = vector.extract_strided_slice %234 {offsets = [0, 80], sizes = [16, 8], strides = [1, 1]} : vector<16x96xf32> to vector<16x8xf32>
    %290 = vector.shape_cast %289 : vector<16x8xf32> to vector<2x8x8xf32>
    "tpu.trace_start"() <{level = 10 : i32, message = "bqd,bkd->bqk"}> : () -> ()
    %cst_136 = arith.constant dense<0.000000e+00> : vector<2x8x8xf32>
    %291 = tpu.matmul %286, %288, %cst_136 {dimension_numbers = #tpu.dot_dimension_numbers<[2], [2], [1], [1], [0, 0, 0, 1, 1, 1], [0], [0]>} : vector<2x8x8xf32>, vector<2x8x8xf32>, vector<2x8x8xf32> -> vector<2x8x8xf32>
    "tpu.trace_stop"() : () -> ()
    %cst_137 = arith.constant 0.353553385 : f32
    %292 = vector.broadcast %cst_137 : f32 to vector<2x8x8xf32>
    %293 = arith.mulf %291, %292 : vector<2x8x8xf32>
    %294 = vector.broadcast %0 : vector<2x1x8xf32> to vector<2x8x8xf32>
    %295 = arith.addf %293, %294 : vector<2x8x8xf32>
    %cst_138 = arith.constant dense<0xFF800000> : vector<2x8xf32>
    %296 = vector.multi_reduction <maximumf>, %295, %cst_138 [2] : vector<2x8x8xf32> to vector<2x8xf32>
    %297 = vector.shape_cast %296 : vector<2x8xf32> to vector<2x8x1xf32>
    %298 = vector.broadcast %297 : vector<2x8x1xf32> to vector<2x8x8xf32>
    %299 = arith.subf %295, %298 : vector<2x8x8xf32>
    %300 = math.exp %299 : vector<2x8x8xf32>
    %cst_139 = arith.constant dense<0.000000e+00> : vector<2x8xf32>
    %301 = vector.multi_reduction <add>, %300, %cst_139 [2] : vector<2x8x8xf32> to vector<2x8xf32>
    %302 = vector.shape_cast %301 : vector<2x8xf32> to vector<2x8x1xf32>
    %303 = vector.broadcast %302 : vector<2x8x1xf32> to vector<2x8x8xf32>
    %304 = arith.divf %300, %303 : vector<2x8x8xf32>
    %c1_140 = arith.constant 1 : index
    %c2_141 = arith.constant 2 : index
    %c0_142 = arith.constant 0 : index
    %c0_143 = arith.constant 0 : index
    %c0_144 = arith.constant 0 : index
    %305 = vector.load %arg21[%c1_140, %c2_141, %c0_142, %c0_143, %c0_144] : memref<2x4x2x8x8xf32, #tpu.memory_space<vmem>>, vector<1x1x2x8x8xf32>
    %306 = vector.shape_cast %305 : vector<1x1x2x8x8xf32> to vector<2x8x8xf32>
    %307 = vector.shape_cast %304 : vector<2x8x8xf32> to vector<1x1x2x8x8xf32>
    tpu.vector_store %arg21[%c1_140, %c2_141, %c0_142, %c0_143, %c0_144], %307 {strides = array<i32>} : memref<2x4x2x8x8xf32, #tpu.memory_space<vmem>>, vector<1x1x2x8x8xf32>,
    "tpu.trace_start"() <{level = 10 : i32, message = "bqk,bkd->bqd"}> : () -> ()
    %cst_145 = arith.constant dense<0.000000e+00> : vector<2x8x8xf32>
    %308 = tpu.matmul %304, %290, %cst_145 {dimension_numbers = #tpu.dot_dimension_numbers<[2], [1], [1], [2], [0, 0, 0, 1, 1, 2], [0], [0]>} : vector<2x8x8xf32>, vector<2x8x8xf32>, vector<2x8x8xf32> -> vector<2x8x8xf32>
    "tpu.trace_stop"() : () -> ()
    %309 = vector.shape_cast %308 : vector<2x8x8xf32> to vector<16x8xf32>
    %310 = vector.extract_strided_slice %234 {offsets = [0, 24], sizes = [16, 8], strides = [1, 1]} : vector<16x96xf32> to vector<16x8xf32>
    %311 = vector.shape_cast %310 : vector<16x8xf32> to vector<2x8x8xf32>
    %312 = vector.extract_strided_slice %234 {offsets = [0, 56], sizes = [16, 8], strides = [1, 1]} : vector<16x96xf32> to vector<16x8xf32>
    %313 = vector.shape_cast %312 : vector<16x8xf32> to vector<2x8x8xf32>
    %314 = vector.extract_strided_slice %234 {offsets = [0, 88], sizes = [16, 8], strides = [1, 1]} : vector<16x96xf32> to vector<16x8xf32>
    %315 = vector.shape_cast %314 : vector<16x8xf32> to vector<2x8x8xf32>
    "tpu.trace_start"() <{level = 10 : i32, message = "bqd,bkd->bqk"}> : () -> ()
    %cst_146 = arith.constant dense<0.000000e+00> : vector<2x8x8xf32>
    %316 = tpu.matmul %311, %313, %cst_146 {dimension_numbers = #tpu.dot_dimension_numbers<[2], [2], [1], [1], [0, 0, 0, 1, 1, 1], [0], [0]>} : vector<2x8x8xf32>, vector<2x8x8xf32>, vector<2x8x8xf32> -> vector<2x8x8xf32>
    "tpu.trace_stop"() : () -> ()
    %cst_147 = arith.constant 0.353553385 : f32
    %317 = vector.broadcast %cst_147 : f32 to vector<2x8x8xf32>
    %318 = arith.mulf %316, %317 : vector<2x8x8xf32>
    %319 = vector.broadcast %0 : vector<2x1x8xf32> to vector<2x8x8xf32>
    %320 = arith.addf %318, %319 : vector<2x8x8xf32>
    %cst_148 = arith.constant dense<0xFF800000> : vector<2x8xf32>
    %321 = vector.multi_reduction <maximumf>, %320, %cst_148 [2] : vector<2x8x8xf32> to vector<2x8xf32>
    %322 = vector.shape_cast %321 : vector<2x8xf32> to vector<2x8x1xf32>
    %323 = vector.broadcast %322 : vector<2x8x1xf32> to vector<2x8x8xf32>
    %324 = arith.subf %320, %323 : vector<2x8x8xf32>
    %325 = math.exp %324 : vector<2x8x8xf32>
    %cst_149 = arith.constant dense<0.000000e+00> : vector<2x8xf32>
    %326 = vector.multi_reduction <add>, %325, %cst_149 [2] : vector<2x8x8xf32> to vector<2x8xf32>
    %327 = vector.shape_cast %326 : vector<2x8xf32> to vector<2x8x1xf32>
    %328 = vector.broadcast %327 : vector<2x8x1xf32> to vector<2x8x8xf32>
    %329 = arith.divf %325, %328 : vector<2x8x8xf32>
    %c1_150 = arith.constant 1 : index
    %c3_151 = arith.constant 3 : index
    %c0_152 = arith.constant 0 : index
    %c0_153 = arith.constant 0 : index
    %c0_154 = arith.constant 0 : index
    %330 = vector.load %arg21[%c1_150, %c3_151, %c0_152, %c0_153, %c0_154] : memref<2x4x2x8x8xf32, #tpu.memory_space<vmem>>, vector<1x1x2x8x8xf32>
    %331 = vector.shape_cast %330 : vector<1x1x2x8x8xf32> to vector<2x8x8xf32>
    %332 = vector.shape_cast %329 : vector<2x8x8xf32> to vector<1x1x2x8x8xf32>
    tpu.vector_store %arg21[%c1_150, %c3_151, %c0_152, %c0_153, %c0_154], %332 {strides = array<i32>} : memref<2x4x2x8x8xf32, #tpu.memory_space<vmem>>, vector<1x1x2x8x8xf32>,
    "tpu.trace_start"() <{level = 10 : i32, message = "bqk,bkd->bqd"}> : () -> ()
    %cst_155 = arith.constant dense<0.000000e+00> : vector<2x8x8xf32>
    %333 = tpu.matmul %329, %315, %cst_155 {dimension_numbers = #tpu.dot_dimension_numbers<[2], [1], [1], [2], [0, 0, 0, 1, 1, 2], [0], [0]>} : vector<2x8x8xf32>, vector<2x8x8xf32>, vector<2x8x8xf32> -> vector<2x8x8xf32>
    "tpu.trace_stop"() : () -> ()
    %334 = vector.shape_cast %333 : vector<2x8x8xf32> to vector<16x8xf32>
    %335 = tpu.concatenate %259, %284, %309, %334 in 1 : vector<16x8xf32>, vector<16x8xf32>, vector<16x8xf32>, vector<16x8xf32> -> vector<16x32xf32>
    %c1_156 = arith.constant 1 : index
    %c0_157 = arith.constant 0 : index
    %c0_158 = arith.constant 0 : index
    %336 = vector.load %arg6[%c1_156, %c0_157, %c0_158] : memref<2x32x32xf32, #tpu.memory_space<vmem>>, vector<1x32x32xf32>
    %337 = vector.shape_cast %336 : vector<1x32x32xf32> to vector<32x32xf32>
    %cst_159 = arith.constant dense<0.000000e+00> : vector<16x32xf32>
    %338 = tpu.matmul %335, %337, %cst_159 {dimension_numbers = #tpu.dot_dimension_numbers<[1], [0], [0], [1], [0, 0, 1, 1], [], []>} : vector<16x32xf32>, vector<32x32xf32>, vector<16x32xf32> -> vector<16x32xf32>
    %c1_160 = arith.constant 1 : index
    %c0_161 = arith.constant 0 : index
    %c0_162 = arith.constant 0 : index
    %339 = vector.load %arg7[%c1_160, %c0_161, %c0_162] : memref<2x1x32xf32, #tpu.memory_space<vmem>>, vector<1x1x32xf32>
    %340 = vector.shape_cast %339 : vector<1x1x32xf32> to vector<1x32xf32>
    %341 = vector.broadcast %340 : vector<1x32xf32> to vector<16x32xf32>
    %342 = arith.addf %338, %341 : vector<16x32xf32>
    %343 = arith.addf %342, %224 : vector<16x32xf32>
    %c1_163 = arith.constant 1 : index
    %c0_164 = arith.constant 0 : index
    %c0_165 = arith.constant 0 : index
    %344 = vector.load %arg8[%c1_163, %c0_164, %c0_165] : memref<2x1x32xf32, #tpu.memory_space<vmem>>, vector<1x1x32xf32>
    %345 = vector.shape_cast %344 : vector<1x1x32xf32> to vector<1x32xf32>
    %c1_166 = arith.constant 1 : index
    %c0_167 = arith.constant 0 : index
    %c0_168 = arith.constant 0 : index
    %346 = vector.load %arg9[%c1_166, %c0_167, %c0_168] : memref<2x1x32xf32, #tpu.memory_space<vmem>>, vector<1x1x32xf32>
    %347 = vector.shape_cast %346 : vector<1x1x32xf32> to vector<1x32xf32>
    %cst_169 = arith.constant dense<0.000000e+00> : vector<16xf32>
    %348 = vector.multi_reduction <add>, %343, %cst_169 [1] : vector<16x32xf32> to vector<16xf32>
    %349 = vector.shape_cast %348 : vector<16xf32> to vector<16x1xf32>
    %cst_170 = arith.constant 3.200000e+01 : f32
    %350 = vector.broadcast %cst_170 : f32 to vector<16x1xf32>
    %351 = arith.divf %349, %350 : vector<16x1xf32>
    %352 = vector.broadcast %351 : vector<16x1xf32> to vector<16x32xf32>
    %353 = arith.subf %343, %352 : vector<16x32xf32>
    %354 = arith.mulf %353, %353 : vector<16x32xf32>
    %cst_171 = arith.constant dense<0.000000e+00> : vector<16xf32>
    %355 = vector.multi_reduction <add>, %354, %cst_171 [1] : vector<16x32xf32> to vector<16xf32>
    %356 = vector.shape_cast %355 : vector<16xf32> to vector<16x1xf32>
    %cst_172 = arith.constant 3.200000e+01 : f32
    %357 = vector.broadcast %cst_172 : f32 to vector<16x1xf32>
    %358 = arith.divf %356, %357 : vector<16x1xf32>
    %359 = vector.broadcast %351 : vector<16x1xf32> to vector<16x32xf32>
    %360 = arith.subf %343, %359 : vector<16x32xf32>
    %cst_173 = arith.constant 9.99999996E-13 : f32
    %361 = vector.broadcast %cst_173 : f32 to vector<16x1xf32>
    %362 = arith.addf %358, %361 : vector<16x1xf32>
    %363 = math.rsqrt %362 : vector<16x1xf32>
    %364 = vector.broadcast %363 : vector<16x1xf32> to vector<16x32xf32>
    %365 = arith.mulf %360, %364 : vector<16x32xf32>
    %366 = vector.broadcast %345 : vector<1x32xf32> to vector<16x32xf32>
    %367 = arith.mulf %365, %366 : vector<16x32xf32>
    %368 = vector.broadcast %347 : vector<1x32xf32> to vector<16x32xf32>
    %369 = arith.addf %367, %368 : vector<16x32xf32>
    %c1_174 = arith.constant 1 : index
    %c0_175 = arith.constant 0 : index
    %c0_176 = arith.constant 0 : index
    %370 = vector.load %arg10[%c1_174, %c0_175, %c0_176] : memref<2x32x64xf32, #tpu.memory_space<vmem>>, vector<1x32x64xf32>
    %371 = vector.shape_cast %370 : vector<1x32x64xf32> to vector<32x64xf32>
    %cst_177 = arith.constant dense<0.000000e+00> : vector<16x64xf32>
    %372 = tpu.matmul %369, %371, %cst_177 {dimension_numbers = #tpu.dot_dimension_numbers<[1], [0], [0], [1], [0, 0, 1, 1], [], []>} : vector<16x32xf32>, vector<32x64xf32>, vector<16x64xf32> -> vector<16x64xf32>
    %c1_178 = arith.constant 1 : index
    %c0_179 = arith.constant 0 : index
    %c0_180 = arith.constant 0 : index
    %373 = vector.load %arg11[%c1_178, %c0_179, %c0_180] : memref<2x1x64xf32, #tpu.memory_space<vmem>>, vector<1x1x64xf32>
    %374 = vector.shape_cast %373 : vector<1x1x64xf32> to vector<1x64xf32>
    %375 = vector.broadcast %374 : vector<1x64xf32> to vector<16x64xf32>
    %376 = arith.addf %372, %375 : vector<16x64xf32>
    %cst_181 = arith.constant 5.000000e-01 : f32
    %377 = vector.broadcast %cst_181 : f32 to vector<16x64xf32>
    %378 = arith.mulf %377, %376 : vector<16x64xf32>
    %cst_182 = arith.constant 4.471500e-02 : f32
    %379 = vector.broadcast %cst_182 : f32 to vector<16x64xf32>
    %380 = arith.mulf %379, %376 : vector<16x64xf32>
    %381 = arith.mulf %380, %376 : vector<16x64xf32>
    %382 = arith.mulf %381, %376 : vector<16x64xf32>
    %383 = arith.addf %376, %382 : vector<16x64xf32>
    %cst_183 = arith.constant 0.797884583 : f32
    %384 = vector.broadcast %cst_183 : f32 to vector<16x64xf32>
    %385 = arith.mulf %384, %383 : vector<16x64xf32>
    %386 = math.tanh %385 : vector<16x64xf32>
    %cst_184 = arith.constant 1.000000e+00 : f32
    %387 = vector.broadcast %cst_184 : f32 to vector<16x64xf32>
    %388 = arith.addf %387, %386 : vector<16x64xf32>
    %389 = arith.mulf %378, %388 : vector<16x64xf32>
    %c1_185 = arith.constant 1 : index
    %c0_186 = arith.constant 0 : index
    %c0_187 = arith.constant 0 : index
    %390 = vector.load %arg12[%c1_185, %c0_186, %c0_187] : memref<2x64x32xf32, #tpu.memory_space<vmem>>, vector<1x64x32xf32>
    %391 = vector.shape_cast %390 : vector<1x64x32xf32> to vector<64x32xf32>
    %cst_188 = arith.constant dense<0.000000e+00> : vector<16x32xf32>
    %392 = tpu.matmul %389, %391, %cst_188 {dimension_numbers = #tpu.dot_dimension_numbers<[1], [0], [0], [1], [0, 0, 1, 1], [], []>} : vector<16x64xf32>, vector<64x32xf32>, vector<16x32xf32> -> vector<16x32xf32>
    %c1_189 = arith.constant 1 : index
    %c0_190 = arith.constant 0 : index
    %c0_191 = arith.constant 0 : index
    %393 = vector.load %arg13[%c1_189, %c0_190, %c0_191] : memref<2x1x32xf32, #tpu.memory_space<vmem>>, vector<1x1x32xf32>
    %394 = vector.shape_cast %393 : vector<1x1x32xf32> to vector<1x32xf32>
    %395 = vector.broadcast %394 : vector<1x32xf32> to vector<16x32xf32>
    %396 = arith.addf %392, %395 : vector<16x32xf32>
    %397 = arith.addf %396, %369 : vector<16x32xf32>
    %c1_192 = arith.constant 1 : index
    %c0_193 = arith.constant 0 : index
    %c0_194 = arith.constant 0 : index
    %398 = vector.load %arg14[%c1_192, %c0_193, %c0_194] : memref<2x1x32xf32, #tpu.memory_space<vmem>>, vector<1x1x32xf32>
    %399 = vector.shape_cast %398 : vector<1x1x32xf32> to vector<1x32xf32>
    %c1_195 = arith.constant 1 : index
    %c0_196 = arith.constant 0 : index
    %c0_197 = arith.constant 0 : index
    %400 = vector.load %arg15[%c1_195, %c0_196, %c0_197] : memref<2x1x32xf32, #tpu.memory_space<vmem>>, vector<1x1x32xf32>
    %401 = vector.shape_cast %400 : vector<1x1x32xf32> to vector<1x32xf32>
    %cst_198 = arith.constant dense<0.000000e+00> : vector<16xf32>
    %402 = vector.multi_reduction <add>, %397, %cst_198 [1] : vector<16x32xf32> to vector<16xf32>
    %403 = vector.shape_cast %402 : vector<16xf32> to vector<16x1xf32>
    %cst_199 = arith.constant 3.200000e+01 : f32
    %404 = vector.broadcast %cst_199 : f32 to vector<16x1xf32>
    %405 = arith.divf %403, %404 : vector<16x1xf32>
    %406 = vector.broadcast %405 : vector<16x1xf32> to vector<16x32xf32>
    %407 = arith.subf %397, %406 : vector<16x32xf32>
    %408 = arith.mulf %407, %407 : vector<16x32xf32>
    %cst_200 = arith.constant dense<0.000000e+00> : vector<16xf32>
    %409 = vector.multi_reduction <add>, %408, %cst_200 [1] : vector<16x32xf32> to vector<16xf32>
    %410 = vector.shape_cast %409 : vector<16xf32> to vector<16x1xf32>
    %cst_201 = arith.constant 3.200000e+01 : f32
    %411 = vector.broadcast %cst_201 : f32 to vector<16x1xf32>
    %412 = arith.divf %410, %411 : vector<16x1xf32>
    %413 = vector.broadcast %405 : vector<16x1xf32> to vector<16x32xf32>
    %414 = arith.subf %397, %413 : vector<16x32xf32>
    %cst_202 = arith.constant 9.99999996E-13 : f32
    %415 = vector.broadcast %cst_202 : f32 to vector<16x1xf32>
    %416 = arith.addf %412, %415 : vector<16x1xf32>
    %417 = math.rsqrt %416 : vector<16x1xf32>
    %418 = vector.broadcast %417 : vector<16x1xf32> to vector<16x32xf32>
    %419 = arith.mulf %414, %418 : vector<16x32xf32>
    %420 = vector.broadcast %399 : vector<1x32xf32> to vector<16x32xf32>
    %421 = arith.mulf %419, %420 : vector<16x32xf32>
    %422 = vector.broadcast %401 : vector<1x32xf32> to vector<16x32xf32>
    %423 = arith.addf %421, %422 : vector<16x32xf32>
    %c2_203 = arith.constant 2 : index
    %c0_204 = arith.constant 0 : index
    %c0_205 = arith.constant 0 : index
    %424 = vector.load %arg20[%c2_203, %c0_204, %c0_205] : memref<3x16x32xf32, #tpu.memory_space<vmem>>, vector<1x16x32xf32>
    %425 = vector.shape_cast %424 : vector<1x16x32xf32> to vector<16x32xf32>
    %426 = vector.shape_cast %423 : vector<16x32xf32> to vector<1x16x32xf32>
    tpu.vector_store %arg20[%c2_203, %c0_204, %c0_205], %426 {strides = array<i32>} : memref<3x16x32xf32, #tpu.memory_space<vmem>>, vector<1x16x32xf32>,
    %427 = vector.shape_cast %423 : vector<16x32xf32> to vector<2x8x32xf32>
    %428 = vector.extract_strided_slice %427 {offsets = [0, 0, 0], sizes = [2, 1, 32], strides = [1, 1, 1]} : vector<2x8x32xf32> to vector<2x1x32xf32>
    %429 = vector.shape_cast %428 : vector<2x1x32xf32> to vector<2x32xf32>
    %c0_206 = arith.constant 0 : index
    %c0_207 = arith.constant 0 : index
    %430 = vector.load %arg16[%c0_206, %c0_207] : memref<32x32xf32, #tpu.memory_space<vmem>>, vector<32x32xf32>
    %cst_208 = arith.constant dense<0.000000e+00> : vector<2x32xf32>
    %431 = tpu.matmul %429, %430, %cst_208 {dimension_numbers = #tpu.dot_dimension_numbers<[1], [0], [0], [1], [0, 0, 1, 1], [], []>} : vector<2x32xf32>, vector<32x32xf32>, vector<2x32xf32> -> vector<2x32xf32>
    %c0_209 = arith.constant 0 : index
    %c0_210 = arith.constant 0 : index
    %432 = vector.load %arg17[%c0_209, %c0_210] : memref<1x32xf32, #tpu.memory_space<vmem>>, vector<1x32xf32>
    %433 = vector.broadcast %432 : vector<1x32xf32> to vector<2x32xf32>
    %434 = arith.addf %431, %433 : vector<2x32xf32>
    %435 = math.tanh %434 : vector<2x32xf32>
    %c0_211 = arith.constant 0 : index
    %c0_212 = arith.constant 0 : index
    %436 = vector.load %arg22[%c0_211, %c0_212] : memref<2x32xf32, #tpu.memory_space<vmem>>, vector<2x32xf32>
    tpu.vector_store %arg22[%c0_211, %c0_212], %435 {strides = array<i32>} : memref<2x32xf32, #tpu.memory_space<vmem>>, vector<2x32xf32>,
    %c0_213 = arith.constant 0 : index
    %c0_214 = arith.constant 0 : index
    %437 = vector.load %arg18[%c0_213, %c0_214] : memref<32x2xf32, #tpu.memory_space<vmem>>, vector<32x2xf32>
    %cst_215 = arith.constant dense<0.000000e+00> : vector<2x2xf32>
    %438 = tpu.matmul %435, %437, %cst_215 {dimension_numbers = #tpu.dot_dimension_numbers<[1], [0], [0], [1], [0, 0, 1, 1], [], []>} : vector<2x32xf32>, vector<32x2xf32>, vector<2x2xf32> -> vector<2x2xf32>
    %c0_216 = arith.constant 0 : index
    %c0_217 = arith.constant 0 : index
    %439 = vector.load %arg19[%c0_216, %c0_217] : memref<1x2xf32, #tpu.memory_space<vmem>>, vector<1x2xf32>
    %440 = vector.broadcast %439 : vector<1x2xf32> to vector<2x2xf32>
    %441 = arith.addf %438, %440 : vector<2x2xf32>
    %c0_218 = arith.constant 0 : index
    %c0_219 = arith.constant 0 : index
    %442 = vector.load %arg23[%c0_218, %c0_219] : memref<2x2xf32, #tpu.memory_space<vmem>>, vector<2x2xf32>
    tpu.vector_store %arg23[%c0_218, %c0_219], %441 {strides = array<i32>} : memref<2x2xf32, #tpu.memory_space<vmem>>, vector<2x2xf32>,
    return
  }
}

</mosaic_0001>

<bundles_post_ra>
// kernel: bert_sentiment_forward.1
= control target key start
LH: loop header
LB: loop body
LE: loop exit
PB: predicated region body
PF: predicated region fallthrough
CT: control target
= control target key end

     0   :  { %s5673_s0 = inlined_call_operand.vmem [shape: f32[16,32], index: 0, kind: input, shape index: {}]   ;;  %s5674_s1 = inlined_call_operand.vmem [shape: f32[2,1,8], index: 1, kind: input, shape index: {}]   ;;  %s5675_s2 = inlined_call_operand.vmem [shape: f32[1,32], index: 2, kind: input, shape index: {}]   ;;  %s5676_s3 = inlined_call_operand.vmem [shape: f32[1,32], index: 3, kind: input, shape index: {}]   ;;  %s5677_s4 = inlined_call_operand.vmem [shape: f32[2,32,96], index: 4, kind: input, shape index: {}]   ;;  %s5678_s5 = inlined_call_operand.vmem [shape: f32[2,1,96], index: 5, kind: input, shape index: {}]   ;;  %s5679_s6 = inlined_call_operand.vmem [shape: f32[2,32,32], index: 6, kind: input, shape index: {}]   ;;  %s5680_s7 = inlined_call_operand.vmem [shape: f32[2,1,32], index: 7, kind: input, shape index: {}]   ;;  %s5681_s8 = inlined_call_operand.vmem [shape: f32[2,1,32], index: 8, kind: input, shape index: {}]   ;;  %s5682_s9 = inlined_call_operand.vmem [shape: f32[2,1,32], index: 9, kind: input, shape index: {}]   ;;  %s5683_s10 = inlined_call_operand.vmem [shape: f32[2,32,64], index: 10, kind: input, shape index: {}]   ;;  %s5684_s11 = inlined_call_operand.vmem [shape: f32[2,1,64], index: 11, kind: input, shape index: {}]   ;;  %s5685_s12 = inlined_call_operand.vmem [shape: f32[2,64,32], index: 12, kind: input, shape index: {}]   ;;  %s5686_s13 = inlined_call_operand.vmem [shape: f32[2,1,32], index: 13, kind: input, shape index: {}]   ;;  %s5687_s14 = inlined_call_operand.vmem [shape: f32[2,1,32], index: 14, kind: input, shape index: {}]   ;;  %s5688_s15 = inlined_call_operand.vmem [shape: f32[2,1,32], index: 15, kind: input, shape index: {}]   ;;  %s5689_s16 = inlined_call_operand.vmem [shape: f32[32,32], index: 16, kind: input, shape index: {}]   ;;  %s5690_s17 = inlined_call_operand.vmem [shape: f32[1,32], index: 17, kind: input, shape index: {}]   ;;  %s5691_s18 = inlined_call_operand.vmem [shape: f32[32,2], index: 18, kind: input, shape index: {}]   ;;  %s5692_s19 = inlined_call_operand.vmem [shape: f32[1,2], index: 19, kind: input, shape index: {}]   ;;  %s5693_s20 = inlined_call_operand.vmem [shape: f32[3,16,32], index: 20, kind: output, shape index: {0}]   ;;  %s5694_s21 = inlined_call_operand.vmem [shape: f32[2,4,2,8,8], index: 21, kind: output, shape index: {1}]   ;;  %s5695_s22 = inlined_call_operand.hbm [shape: f32[2,32], index: 22, kind: output, shape index: {2}]   ;;  %s5696_s23 = inlined_call_operand.hbm [shape: f32[2,2], index: 23, kind: output, shape index: {3}]  }
   0x1   :  { %5727 = sst [smem:[#allocation8_spill]] %s5673_s0 }
   0x2   :  { %5728 = sst [smem:[#allocation9_spill]] %s5674_s1 }
   0x3   :  { %5729 = sst [smem:[#allocation10_spill]] %s5675_s2 }
   0x4   :  { %5730 = sst [smem:[#allocation11_spill]] %s5676_s3 }
   0x5   :  { %5731 = sst [smem:[#allocation12_spill]] %s5677_s4 }
   0x6   :  { %5732 = sst [smem:[#allocation13_spill]] %s5678_s5 }
   0x7   :  { %5733 = sst [smem:[#allocation14_spill]] %s5679_s6 }
   0x8   :  { %5734 = sst [smem:[#allocation15_spill]] %s5680_s7 }
   0x9   :  { %29 = vsyncpa [#allocation3], 0  ;;  %s5735_s24 = sld [smem:[#allocation8_spill]]  ;;  %vm77_vm0 = vcmask 261120  }
   0xf   :  { %v73_v0 = vld [vmem:[%s5735_s24] sm:$0xff]  ;;  %v74_v1 = vld [vmem:[%s5735_s24 + $0x8] sm:$0xff] }
  0x10   :  { %30 = vsyncpa [#allocation5], 0  ;;  %v78_v2 = vsel %vm77_vm0, %v73_v0, 0.0  ;;  %v81_v3 = vsel %vm77_vm0, %v74_v1, 0.0  ;;  %s5736_s2 = sld [smem:[#allocation12_spill]]  ;;  %v4793_v34 = vmov 0.0  }
  0x11   :  { %79 = vadd.xlane.f32.xlu0 %v78_v2  ;;  %s5737_s30 = sld [smem:[#allocation10_spill]]  ;;  %4360 = vmatprep.subr.mxu1 %v4793_v34  ;;  %vm4794_vm1 = vmmov 0   ;;  %s4795_s3 = smov 96   ;;  %vm218_vm2 = vcmask 64512   ;;  %vm1602_vm3 = vcmask 195584   ;;  %vm1599_vm4 = vcmask 130048  }
  0x12   :  { %s5738_s5 = sld [smem:[#allocation11_spill]]  ;;  %4362 = vmatprep.mubr.msk.f32.mxu1 %vm4794_vm1, %v4793_v34  ;;  %s5725_s1 = smov 88   ;;  %vm1868_vm5 = vcmask 523264   ;;  %vm3886_vm6 = vcmask 1041409   ;;  %vm3961_vm7 = vcmask 254976  }
  0x13   :  { %s5739_s29 = sld [smem:[#allocation13_spill]]  ;;  %s5721_s26 = smov 120  }
  0x14   :  { %s5719_s0 = smov 56   ;;  %s5717_s4 = smov 80  }
  0x15   :  { %82 = vadd.xlane.f32.xlu0 %v81_v3  ;;  %s5715_s24 = smov 112   ;;  %s5713_s28 = smov 48  }
  0x16   :  { %v126_v14 = vld [vmem:[%s5736_s2 + $0x18] sm:$0xff]  ;;  %v125_v15 = vld [vmem:[%s5736_s2 + $0x10] sm:$0xff]  ;;  %v124_v16 = vld [vmem:[%s5736_s2 + $0x8] sm:$0xff]  ;;  %s5705_s25 = smov 72   ;;  %s5703_s6 = smov 104  }
  0x17   :  { %4349 = vmatprep.subr.mxu0 %v126_v14  ;;  %v123_v17 = vld [vmem:[%s5736_s2] sm:$0xff]  ;;  %s5711_s27 = smov 16  }
  0x18   :  { %4350 = vmatpush3.msra.mxu0 %v126_v14  ;;  %v4085_v25 = vld [vmem:[%s5737_s30] ss:$0 sm:$0xff]  ;;  %s5740_s30 = sld [smem:[#allocation9_spill]] }
  0x19   :  { %4351 = vmatprep.subr.mxu0 %v125_v15  ;;  %v4086_v27 = vld [vmem:[%s5738_s5] ss:$0 sm:$0xff]  ;;  %s4796_s5 = smov 64  }
  0x1a   :  { %4352 = vmatpush3.msra.mxu0 %v125_v15  ;;  %v4087_v35 = vld [vmem:[%s5739_s29] ss:$0 sm:$0xff] }
  0x1b   :  { %4353 = vmatprep.subr.mxu0 %v124_v16 }
  0x1c   :  { %4354 = vmatpush3.msra.mxu0 %v124_v16 }
  0x1d   :  { %4355 = vmatprep.subr.mxu0 %v123_v17 }
  0x1e   :  { %4356 = vmatpush3.msra.mxu0 %v123_v17  ;;  %v5009_v43 = vld [vmem:[%s5740_s30] ss:$0 sm:$0xff]  ;;  %v5015_v48 = vld [vmem:[%s5740_s30 + $0x1] ss:$0 sm:$0xff] }
  0x1f   :  { %4370 = vmatprep.subr.mxu0 %v4793_v34 }
  0x9a   :  { %v80_v4 = vpop.xlane.xlu0 %79 }
  0x9b   :  { %v85_v5 = vmul.f32 0.03125, %v80_v4 }
  0x9d   :  { %v87_v6 = vsub.f32 %v73_v0, %v85_v5 }
  0x9e   :  { %v83_v7 = vpop.xlane.xlu0 %82 }
  0x9f   :  { %v86_v8 = vmul.f32 0.03125, %v83_v7  ;;  %v89_v9 = vmul.f32 %v87_v6, %v87_v6 }
  0xa1   :  { %v88_v10 = vsub.f32 %v74_v1, %v86_v8  ;;  %v91_v11 = vsel %vm77_vm0, %v89_v9, 0.0 }
  0xa2   :  { %92 = vadd.xlane.f32.xlu1 %v91_v11 }
  0xa3   :  { %v90_v12 = vmul.f32 %v88_v10, %v88_v10 }
  0xa5   :  { %v94_v13 = vsel %vm77_vm0, %v90_v12, 0.0 }
  0xa6   :  { %95 = vadd.xlane.f32.xlu1 %v94_v13 }
 0x12b   :  { %v93_v18 = vpop.xlane.xlu1 %92 }
 0x12c   :  { %v97_v19 = vmul.f32 0.03125, %v93_v18 }
 0x12e   :  { %v99_v20 = vadd.f32 1e-12, %v97_v19 }
 0x12f   :  { %v96_v21 = vpop.xlane.xlu1 %95 }
 0x130   :  { %4653 = vrsqrt.f32 %v99_v20  ;;  %v98_v22 = vmul.f32 0.03125, %v96_v21 }
 0x132   :  { %v100_v23 = vadd.f32 1e-12, %v98_v22 }
 0x134   :  { %4655 = vrsqrt.f32 %v100_v23 }
 0x13d   :  { %v4654_v24 = vpop.eup %4653 }
 0x13e   :  { %v103_v26 = vmul.f32 %v4654_v24, %v87_v6 }
 0x140   :  { %v111_v28 = vmul.f32 %v4085_v25, %v103_v26 }
 0x141   :  { %v4656_v29 = vpop.eup %4655 }
 0x142   :  { %v104_v30 = vmul.f32 %v4656_v29, %v88_v10  ;;  %v4959_v31 = vadd.f32 %v4086_v27, %v111_v28 }
 0x144   :  { %v112_v32 = vmul.f32 %v4085_v25, %v104_v30  ;;  %121 = vst.msk [vmem:[%s5693_s20] sm:$0xff] %vm77_vm0, %v4959_v31  ;;  %4357 = vmatprep.mubr.msk.f32.mxu0 %vm77_vm0, %v4959_v31 }
 0x146   :  { %v4968_v33 = vadd.f32 %v4086_v27, %v112_v32 }
 0x148   :  { %122 = vst.msk [vmem:[%s5693_s20 + $0x8] sm:$0xff] %vm77_vm0, %v4968_v33  ;;  %4358 = vmatmul.mubr.msk.f32.vlgmr.msra.gmra.mxu0 %vm77_vm0, %v4968_v33 }
 0x149   :  { %4372 = vmatprep.mubr.msk.f32.mxu0 %vm4794_vm1, %v4793_v34 }
 0x208   :  { %v4359_v36 = vpop.f32.mrf.mxu0 }
 0x209   :  { %v4986_v37 = vadd.f32 %v4359_v36, %v4087_v35 }
 0x20a   :  { %v206_v38 = vpop.f32.mrf.mxu0 }
 0x20b   :  { %v4988_v39 = vadd.f32 %v4087_v35, %v206_v38  ;;  %294 = vrot.lane.b32.xlu1 %v4986_v37, %s4795_s3 }
 0x20d   :  { %216 = vrot.lane.b32.xlu0 %v4988_v39, %s4795_s3 }
 0x27d   :  { %v295_v41 = vpop.permute.xlu1 %294 }
 0x27f   :  { %v217_v40 = vpop.permute.xlu0 %216 }
 0x280   :  { %4361 = vmatpush3.xpose.msk.msra.mxu1 %vm218_vm2, %v217_v40 }
 0x281   :  { %4365 = vmatprep.subr.mxu1 %v4793_v34 }
 0x283   :  { %4363 = vmatmul.mubr.msk.f32.vlgmr.msra.gmra.mxu1 %vm218_vm2, %v4988_v39 }
 0x284   :  { %4366 = vmatpush3.xpose.msk.msra.mxu1 %vm218_vm2, %v295_v41  ;;  %4367 = vmatprep.mubr.msk.f32.mxu1 %vm4794_vm1, %v4793_v34 }
 0x285   :  { %4375 = vmatprep.subr.mxu1 %v4793_v34 }
 0x287   :  { %4368 = vmatmul.mubr.msk.f32.vlgmr.msra.gmra.mxu1 %vm218_vm2, %v4986_v37 }
 0x288   :  { %4377 = vmatprep.mubr.msk.f32.mxu1 %vm4794_vm1, %v4793_v34 }
 0x343   :  { %v289_v42 = vpop.f32.mrf.mxu1 }
 0x344   :  { %v370_v44 = vmul.f32 0.35355338, %v289_v42 }
 0x345   :  { %v4364_v45 = vpop.f32.mrf.mxu1 }
 0x346   :  { %v384_v46 = vadd.f32 %v5009_v43, %v370_v44 }
 0x347   :  { %v366_v47 = vpop.f32.mrf.mxu1 }
 0x348   :  { %v371_v49 = vmul.f32 0.35355338, %v366_v47  ;;  %v386_v50 = vsel %vm218_vm2, %v384_v46, -inf }
 0x349   :  { %v4369_v51 = vpop.f32.mrf.mxu1  ;;  %387 = vmax.xlane.f32.xlu1 %v386_v50 }
 0x34a   :  { %v385_v52 = vadd.f32 %v5015_v48, %v371_v49 }
 0x34c   :  { %v389_v53 = vsel %vm218_vm2, %v385_v52, -inf }
 0x34d   :  { %390 = vmax.xlane.f32.xlu0 %v389_v53 }
 0x35a   :  { %486 = vrot.lane.b32.xlu1 %v4986_v37, %s4796_s5 }
 0x35e   :  { %564 = vrot.lane.b32.xlu1 %v4988_v39, %s5725_s1 }
 0x362   :  { %642 = vrot.lane.b32.xlu1 %v4986_v37, %s5725_s1 }
 0x3d2   :  { %v388_v54 = vpop.xlane.xlu1 %387 }
 0x3d3   :  { %v392_v55 = vsub.f32 %v384_v46, %v388_v54 }
 0x3d5   :  { %v394_v56 = vmul.f32 1.442695, %v392_v55 }
 0x3d6   :  { %v391_v57 = vpop.xlane.xlu0 %390  ;;  %v487_v58 = vpop.permute.xlu1 %486 }
 0x3d7   :  { %4657 = vpow2.f32 %v394_v56  ;;  %v393_v59 = vsub.f32 %v385_v52, %v391_v57  ;;  %4376 = vmatpush3.msra.mxu1 %v487_v58 }
 0x3d8   :  { %4385 = vmatprep.subr.mxu1 %v4793_v34 }
 0x3d9   :  { %v396_v60 = vmul.f32 1.442695, %v393_v59 }
 0x3da   :  { %v565_v1 = vpop.permute.xlu1 %564 }
 0x3db   :  { %4659 = vpow2.f32 %v396_v60 }
 0x3de   :  { %v643_v2 = vpop.permute.xlu1 %642 }
 0x3e4   :  { %v4658_v61 = vpop.eup %4657 }
 0x3e5   :  { %v398_v62 = vsel %vm218_vm2, %v4658_v61, 0.0 }
 0x3e6   :  { %399 = vadd.xlane.f32.xlu0 %v398_v62 }
 0x3e8   :  { %v4660_v63 = vpop.eup %4659 }
 0x3e9   :  { %v401_v0 = vsel %vm218_vm2, %v4660_v63, 0.0 }
 0x3ea   :  { %402 = vadd.xlane.f32.xlu1 %v401_v0 }
 0x3fb   :  { %640 = vrot.lane.b32.xlu1 %v4986_v37, %s5721_s26 }
 0x3fc   :  { %410 = vrot.lane.b32.xlu0 %v4988_v39, %s4796_s5 }
 0x400   :  { %562 = vrot.lane.b32.xlu0 %v4988_v39, %s5721_s26 }
 0x46f   :  { %v400_v3 = vpop.xlane.xlu0 %399 }
 0x470   :  { %4661 = vrcp.f32 %v400_v3 }
 0x473   :  { %v411_v4 = vpop.permute.xlu0 %410  ;;  %v403_v5 = vpop.xlane.xlu1 %402 }
 0x474   :  { %4663 = vrcp.f32 %v403_v5  ;;  %4371 = vmatpush3.msra.mxu0 %v411_v4 }
 0x475   :  { %4380 = vmatprep.subr.mxu0 %v4793_v34 }
 0x477   :  { %v563_v10 = vpop.permute.xlu0 %562  ;;  %v641_v11 = vpop.permute.xlu1 %640 }
 0x47d   :  { %v4662_v6 = vpop.eup %4661 }
 0x47e   :  { %v405_v7 = vmul.f32 %v4662_v6, %v4658_v61 }
 0x480   :  { %408 = vst.msk [vmem:[%s5694_s21] sm:$0xff] %vm218_vm2, %v405_v7  ;;  %4373 = vmatmul.mubr.msk.f32.vlgmr.msra.gmra.mxu0 %vm218_vm2, %v405_v7 }
 0x481   :  { %v4664_v8 = vpop.eup %4663  ;;  %4381 = vmatpush3.xpose.msk.msra.mxu0 %vm218_vm2, %v565_v1  ;;  %4382 = vmatprep.mubr.msk.f32.mxu0 %vm4794_vm1, %v4793_v34 }
 0x482   :  { %v407_v9 = vmul.f32 %v4664_v8, %v4660_v63  ;;  %4390 = vmatprep.subr.mxu0 %v4793_v34 }
 0x484   :  { %409 = vst.msk [vmem:[%s5694_s21 + $0x8] sm:$0xff] %vm218_vm2, %v407_v9  ;;  %4378 = vmatmul.mubr.msk.f32.vlgmr.msra.gmra.mxu1 %vm218_vm2, %v407_v9  ;;  %4383 = vmatmul.mubr.msk.f32.vlgmr.msra.gmra.mxu0 %vm218_vm2, %v563_v10 }
 0x485   :  { %4386 = vmatpush3.xpose.msk.msra.mxu1 %vm218_vm2, %v643_v2  ;;  %4387 = vmatprep.mubr.msk.f32.mxu1 %vm4794_vm1, %v4793_v34 }
 0x486   :  { %4395 = vmatprep.subr.mxu1 %v4793_v34  ;;  %4392 = vmatprep.mubr.msk.f32.mxu0 %vm4794_vm1, %v4793_v34 }
 0x488   :  { %4388 = vmatmul.mubr.msk.f32.vlgmr.msra.gmra.mxu1 %vm218_vm2, %v641_v11 }
 0x489   :  { %4397 = vmatprep.mubr.msk.f32.mxu1 %vm4794_vm1, %v4793_v34 }
 0x540   :  { %v5060_v12 = vpop.f32.mrf.mxu0 }
 0x542   :  { %v4374_v13 = vpop.f32.mrf.mxu0 }
 0x544   :  { %v5062_v14 = vpop.f32.mrf.mxu1  ;;  %v636_v15 = vpop.f32.mrf.mxu0 }
 0x545   :  { %v718_v16 = vmul.f32 0.35355338, %v636_v15 }
 0x546   :  { %v4379_v17 = vpop.f32.mrf.mxu1  ;;  %v4384_v18 = vpop.f32.mrf.mxu0 }
 0x547   :  { %v720_v19 = vadd.f32 %v5009_v43, %v718_v16 }
 0x548   :  { %v714_v20 = vpop.f32.mrf.mxu1 }
 0x549   :  { %v719_v21 = vmul.f32 0.35355338, %v714_v20  ;;  %v722_v22 = vsel %vm218_vm2, %v720_v19, -inf }
 0x54a   :  { %723 = vmax.xlane.f32.xlu0 %v722_v22  ;;  %v4389_v23 = vpop.f32.mrf.mxu1 }
 0x54b   :  { %v721_v24 = vadd.f32 %v5015_v48, %v719_v21 }
 0x54d   :  { %v725_v25 = vsel %vm218_vm2, %v721_v24, -inf }
 0x54e   :  { %726 = vmax.xlane.f32.xlu1 %v725_v25 }
 0x55f   :  { %823 = vrot.lane.b32.xlu1 %v4986_v37, %s5719_s0 }
 0x560   :  { %747 = vrot.lane.b32.xlu0 %v4988_v39, %s5719_s0  ;;  %s5745_s0 = smov 56  }
 0x563   :  { %901 = vrot.lane.b32.xlu1 %v4988_v39, %s5717_s4 }
 0x567   :  { %979 = vrot.lane.b32.xlu1 %v4986_v37, %s5717_s4  ;;  %s5741_s4 = sld [smem:[#allocation14_spill]] }
 0x56b   :  { %977 = vrot.lane.b32.xlu1 %v4986_v37, %s5715_s24 }
 0x5d3   :  { %v724_v26 = vpop.xlane.xlu0 %723 }
 0x5d4   :  { %v728_v27 = vsub.f32 %v720_v19, %v724_v26 }
 0x5d6   :  { %v730_v28 = vmul.f32 1.442695, %v728_v27 }
 0x5d7   :  { %v748_v29 = vpop.permute.xlu0 %747  ;;  %v727_v30 = vpop.xlane.xlu1 %726 }
 0x5d8   :  { %4665 = vpow2.f32 %v730_v28  ;;  %v729_v32 = vsub.f32 %v721_v24, %v727_v30  ;;  %4391 = vmatpush3.msra.mxu0 %v748_v29 }
 0x5d9   :  { %4400 = vmatprep.subr.mxu0 %v4793_v34 }
 0x5da   :  { %v732_v35 = vmul.f32 1.442695, %v729_v32 }
 0x5db   :  { %v824_v36 = vpop.permute.xlu1 %823 }
 0x5dc   :  { %4667 = vpow2.f32 %v732_v35  ;;  %4396 = vmatpush3.msra.mxu1 %v824_v36 }
 0x5dd   :  { %4405 = vmatprep.subr.mxu1 %v4793_v34 }
 0x5df   :  { %v902_v46 = vpop.permute.xlu1 %901 }
 0x5e3   :  { %v980_v51 = vpop.permute.xlu1 %979 }
 0x5e5   :  { %v4666_v38 = vpop.eup %4665 }
 0x5e6   :  { %v734_v40 = vsel %vm218_vm2, %v4666_v38, 0.0 }
 0x5e7   :  { %735 = vadd.xlane.f32.xlu0 %v734_v40  ;;  %v978_v54 = vpop.permute.xlu1 %977 }
 0x5e9   :  { %v4668_v41 = vpop.eup %4667 }
 0x5ea   :  { %v737_v42 = vsel %vm218_vm2, %v4668_v41, 0.0 }
 0x5eb   :  { %738 = vadd.xlane.f32.xlu0 %v737_v42 }
 0x601   :  { %899 = vrot.lane.b32.xlu0 %v4988_v39, %s5715_s24  ;;  %s5723_s24 = smov 24  }
 0x670   :  { %v736_v44 = vpop.xlane.xlu0 %735 }
 0x671   :  { %4669 = vrcp.f32 %v736_v44 }
 0x674   :  { %v739_v45 = vpop.xlane.xlu0 %738 }
 0x675   :  { %4671 = vrcp.f32 %v739_v45 }
 0x678   :  { %v900_v53 = vpop.permute.xlu0 %899 }
 0x67e   :  { %v4670_v47 = vpop.eup %4669 }
 0x67f   :  { %v741_v49 = vmul.f32 %v4670_v47, %v4666_v38 }
 0x681   :  { %4102 = vst.msk [vmem:[%s5694_s21 + $0x10] sm:$0xff] %vm218_vm2, %v741_v49  ;;  %4393 = vmatmul.mubr.msk.f32.vlgmr.msra.gmra.mxu0 %vm218_vm2, %v741_v49 }
 0x682   :  { %v4672_v50 = vpop.eup %4671  ;;  %4401 = vmatpush3.xpose.msk.msra.mxu0 %vm218_vm2, %v902_v46  ;;  %4402 = vmatprep.mubr.msk.f32.mxu0 %vm4794_vm1, %v4793_v34 }
 0x683   :  { %v743_v52 = vmul.f32 %v4672_v50, %v4668_v41  ;;  %4410 = vmatprep.subr.mxu0 %v4793_v34 }
 0x685   :  { %4103 = vst.msk [vmem:[%s5694_s21 + $0x18] sm:$0xff] %vm218_vm2, %v743_v52  ;;  %4398 = vmatmul.mubr.msk.f32.vlgmr.msra.gmra.mxu1 %vm218_vm2, %v743_v52  ;;  %4403 = vmatmul.mubr.msk.f32.vlgmr.msra.gmra.mxu0 %vm218_vm2, %v900_v53 }
 0x686   :  { %4406 = vmatpush3.xpose.msk.msra.mxu1 %vm218_vm2, %v980_v51  ;;  %4407 = vmatprep.mubr.msk.f32.mxu1 %vm4794_vm1, %v4793_v34 }
 0x687   :  { %4415 = vmatprep.subr.mxu1 %v4793_v34  ;;  %4412 = vmatprep.mubr.msk.f32.mxu0 %vm4794_vm1, %v4793_v34 }
 0x689   :  { %4408 = vmatmul.mubr.msk.f32.vlgmr.msra.gmra.mxu1 %vm218_vm2, %v978_v54 }
 0x68a   :  { %4417 = vmatprep.mubr.msk.f32.mxu1 %vm4794_vm1, %v4793_v34 }
 0x741   :  { %v5108_v55 = vpop.f32.mrf.mxu0 }
 0x743   :  { %v4394_v56 = vpop.f32.mrf.mxu0 }
 0x745   :  { %v5110_v57 = vpop.f32.mrf.mxu1  ;;  %v973_v58 = vpop.f32.mrf.mxu0 }
 0x746   :  { %v1055_v59 = vmul.f32 0.35355338, %v973_v58 }
 0x747   :  { %v4399_v60 = vpop.f32.mrf.mxu1  ;;  %v4404_v61 = vpop.f32.mrf.mxu0 }
 0x748   :  { %v1057_v62 = vadd.f32 %v5009_v43, %v1055_v59 }
 0x749   :  { %v1051_v63 = vpop.f32.mrf.mxu1 }
 0x74a   :  { %v1056_v0 = vmul.f32 0.35355338, %v1051_v63  ;;  %v1059_v1 = vsel %vm218_vm2, %v1057_v62, -inf }
 0x74b   :  { %1060 = vmax.xlane.f32.xlu0 %v1059_v1  ;;  %v4409_v2 = vpop.f32.mrf.mxu1 }
 0x74c   :  { %v1058_v3 = vadd.f32 %v5015_v48, %v1056_v0 }
 0x74e   :  { %v1062_v4 = vsel %vm218_vm2, %v1058_v3, -inf }
 0x74f   :  { %1063 = vmax.xlane.f32.xlu1 %v1062_v4  ;;  %v1606_v4 = vld [vmem:[%s5741_s4 + $0x8] sm:$0xff] }
 0x760   :  { %1160 = vrot.lane.b32.xlu1 %v4986_v37, %s5713_s28 }
 0x761   :  { %1084 = vrot.lane.b32.xlu0 %v4988_v39, %s5713_s28  ;;  %s5742_s28 = sld [smem:[#allocation15_spill]] }
 0x764   :  { %1238 = vrot.lane.b32.xlu1 %v4988_v39, %s5705_s25 }
 0x768   :  { %1316 = vrot.lane.b32.xlu1 %v4986_v37, %s5705_s25  ;;  %s5709_s25 = smov 40  }
 0x76c   :  { %1314 = vrot.lane.b32.xlu1 %v4986_v37, %s5703_s6 }
 0x7d4   :  { %v1061_v5 = vpop.xlane.xlu0 %1060 }
 0x7d5   :  { %v1065_v6 = vsub.f32 %v1057_v62, %v1061_v5  ;;  %v1605_v5 = vld [vmem:[%s5741_s4] sm:$0xff] }
 0x7d7   :  { %v1067_v7 = vmul.f32 1.442695, %v1065_v6 }
 0x7d8   :  { %v1085_v8 = vpop.permute.xlu0 %1084  ;;  %v1064_v9 = vpop.xlane.xlu1 %1063 }
 0x7d9   :  { %4673 = vpow2.f32 %v1067_v7  ;;  %v1066_v10 = vsub.f32 %v1058_v3, %v1064_v9  ;;  %4411 = vmatpush3.msra.mxu0 %v1085_v8  ;;  %v1607_v3 = vld [vmem:[%s5741_s4 + $0x10] sm:$0xff] }
 0x7da   :  { %4420 = vmatprep.subr.mxu0 %v4793_v34 }
 0x7db   :  { %v1069_v11 = vmul.f32 1.442695, %v1066_v10 }
 0x7dc   :  { %v1161_v13 = vpop.permute.xlu1 %1160 }
 0x7dd   :  { %4675 = vpow2.f32 %v1069_v11  ;;  %4416 = vmatpush3.msra.mxu1 %v1161_v13 }
 0x7de   :  { %4425 = vmatprep.subr.mxu1 %v4793_v34 }
 0x7e0   :  { %v1239_v21 = vpop.permute.xlu1 %1238 }
 0x7e4   :  { %v1317_v25 = vpop.permute.xlu1 %1316 }
 0x7e6   :  { %v4674_v15 = vpop.eup %4673 }
 0x7e7   :  { %v1071_v16 = vsel %vm218_vm2, %v4674_v15, 0.0 }
 0x7e8   :  { %1072 = vadd.xlane.f32.xlu0 %v1071_v16  ;;  %v1315_v28 = vpop.permute.xlu1 %1314 }
 0x7ea   :  { %v4676_v17 = vpop.eup %4675 }
 0x7eb   :  { %v1074_v18 = vsel %vm218_vm2, %v4676_v17, 0.0 }
 0x7ec   :  { %1075 = vadd.xlane.f32.xlu0 %v1074_v18 }
 0x802   :  { %1236 = vrot.lane.b32.xlu0 %v4988_v39, %s5703_s6  ;;  %s5707_s6 = smov 8  }
 0x871   :  { %v1073_v19 = vpop.xlane.xlu0 %1072 }
 0x872   :  { %4677 = vrcp.f32 %v1073_v19 }
 0x875   :  { %v1076_v20 = vpop.xlane.xlu0 %1075 }
 0x876   :  { %4679 = vrcp.f32 %v1076_v20 }
 0x879   :  { %v1237_v27 = vpop.permute.xlu0 %1236 }
 0x87f   :  { %v4678_v22 = vpop.eup %4677 }
 0x880   :  { %v1078_v23 = vmul.f32 %v4678_v22, %v4674_v15 }
 0x882   :  { %4110 = vst.msk [vmem:[%s5694_s21 + $0x20] sm:$0xff] %vm218_vm2, %v1078_v23  ;;  %4413 = vmatmul.mubr.msk.f32.vlgmr.msra.gmra.mxu0 %vm218_vm2, %v1078_v23 }
 0x883   :  { %v4680_v24 = vpop.eup %4679  ;;  %4421 = vmatpush3.xpose.msk.msra.mxu0 %vm218_vm2, %v1239_v21  ;;  %4422 = vmatprep.mubr.msk.f32.mxu0 %vm4794_vm1, %v4793_v34 }
 0x884   :  { %v1080_v26 = vmul.f32 %v4680_v24, %v4676_v17  ;;  %4430 = vmatprep.subr.mxu0 %v4793_v34 }
 0x886   :  { %4111 = vst.msk [vmem:[%s5694_s21 + $0x28] sm:$0xff] %vm218_vm2, %v1080_v26  ;;  %4418 = vmatmul.mubr.msk.f32.vlgmr.msra.gmra.mxu1 %vm218_vm2, %v1080_v26  ;;  %4423 = vmatmul.mubr.msk.f32.vlgmr.msra.gmra.mxu0 %vm218_vm2, %v1237_v27 }
 0x887   :  { %4426 = vmatpush3.xpose.msk.msra.mxu1 %vm218_vm2, %v1317_v25  ;;  %4427 = vmatprep.mubr.msk.f32.mxu1 %vm4794_vm1, %v4793_v34 }
 0x888   :  { %4435 = vmatprep.subr.mxu1 %v4793_v34  ;;  %4432 = vmatprep.mubr.msk.f32.mxu0 %vm4794_vm1, %v4793_v34 }
 0x88a   :  { %4428 = vmatmul.mubr.msk.f32.vlgmr.msra.gmra.mxu1 %vm218_vm2, %v1315_v28 }
 0x88b   :  { %4437 = vmatprep.mubr.msk.f32.mxu1 %vm4794_vm1, %v4793_v34 }
 0x942   :  { %v1156_v29 = vpop.f32.mrf.mxu0 }
 0x944   :  { %v4414_v30 = vpop.f32.mrf.mxu0 }
 0x946   :  { %v1232_v32 = vpop.f32.mrf.mxu1  ;;  %v1310_v35 = vpop.f32.mrf.mxu0 }
 0x947   :  { %v1392_v36 = vmul.f32 0.35355338, %v1310_v35 }
 0x948   :  { %v4419_v38 = vpop.f32.mrf.mxu1  ;;  %v4424_v40 = vpop.f32.mrf.mxu0 }
 0x949   :  { %v1394_v41 = vadd.f32 %v5009_v43, %v1392_v36 }
 0x94a   :  { %v1388_v42 = vpop.f32.mrf.mxu1 }
 0x94b   :  { %v1393_v44 = vmul.f32 0.35355338, %v1388_v42  ;;  %v1396_v45 = vsel %vm218_vm2, %v1394_v41, -inf }
 0x94c   :  { %1397 = vmax.xlane.f32.xlu0 %v1396_v45  ;;  %v4429_v46 = vpop.f32.mrf.mxu1 }
 0x94d   :  { %v1395_v47 = vadd.f32 %v5015_v48, %v1393_v44  ;;  %v1745_v46 = vld [vmem:[%s5683_s10 + $0x10] sm:$0xff] }
 0x94f   :  { %v1399_v49 = vsel %vm218_vm2, %v1395_v47, -inf }
 0x950   :  { %1400 = vmax.xlane.f32.xlu1 %v1399_v49  ;;  %v1743_v49 = vld [vmem:[%s5683_s10] sm:$0xff] }
 0x961   :  { %1497 = vrot.lane.b32.xlu1 %v4986_v37, %s5709_s25 }
 0x965   :  { %1575 = vrot.lane.b32.xlu1 %v5108_v55, %s5707_s6 }
 0x969   :  { %1577 = vrot.lane.b32.xlu1 %v5110_v57, %s5707_s6  ;;  %s5746_s6 = smov 80  }
 0x96d   :  { %1585 = vrot.lane.b32.xlu1 %v1232_v32, %s5711_s27 }
 0x9d5   :  { %v1398_v50 = vpop.xlane.xlu0 %1397 }
 0x9d6   :  { %v1402_v51 = vsub.f32 %v1394_v41, %v1398_v50 }
 0x9d8   :  { %v1404_v52 = vmul.f32 1.442695, %v1402_v51 }
 0x9d9   :  { %v1401_v53 = vpop.xlane.xlu1 %1400 }
 0x9da   :  { %4681 = vpow2.f32 %v1404_v52  ;;  %v1403_v54 = vsub.f32 %v1395_v47, %v1401_v53  ;;  %v1744_v47 = vld [vmem:[%s5683_s10 + $0x8] sm:$0xff] }
 0x9dc   :  { %v1406_v56 = vmul.f32 1.442695, %v1403_v54 }
 0x9dd   :  { %v1498_v58 = vpop.permute.xlu1 %1497 }
 0x9de   :  { %4683 = vpow2.f32 %v1406_v56  ;;  %4436 = vmatpush3.msra.mxu1 %v1498_v58 }
 0x9e1   :  { %v1576_v10 = vpop.permute.xlu1 %1575 }
 0x9e2   :  { %v1597_v15 = vsel %vm218_vm2, %v5060_v12, %v1576_v10  ;;  %v4122_v12 = vld [vmem:[%s5742_s28] ss:$0 sm:$0xff] }
 0x9e5   :  { %v1578_v11 = vpop.permute.xlu1 %1577 }
 0x9e6   :  { %v1598_v20 = vsel %vm218_vm2, %v5062_v14, %v1578_v11 }
 0x9e7   :  { %v4682_v37 = vpop.eup %4681 }
 0x9e8   :  { %v1408_v59 = vsel %vm218_vm2, %v4682_v37, 0.0 }
 0x9e9   :  { %1409 = vadd.xlane.f32.xlu0 %v1408_v59  ;;  %v1586_v16 = vpop.permute.xlu1 %1585 }
 0x9ea   :  { %v1601_v21 = vsel %vm1599_vm4, %v1598_v20, %v1586_v16 }
 0x9eb   :  { %v4684_v55 = vpop.eup %4683 }
 0x9ec   :  { %v1411_v57 = vsel %vm218_vm2, %v4684_v55, 0.0 }
 0x9ed   :  { %1412 = vadd.xlane.f32.xlu0 %v1411_v57 }
 0xa03   :  { %1421 = vrot.lane.b32.xlu0 %v4988_v39, %s5709_s25  ;;  %v1608_v39 = vld [vmem:[%s5741_s4 + $0x18] sm:$0xff]  ;;  %s5749_s25 = smov 72  }
 0xa07   :  { %1583 = vrot.lane.b32.xlu0 %v1156_v29, %s5711_s27  ;;  %s5750_s27 = smov 104  }
 0xa72   :  { %v1410_v60 = vpop.xlane.xlu0 %1409 }
 0xa73   :  { %4685 = vrcp.f32 %v1410_v60 }
 0xa76   :  { %v1413_v61 = vpop.xlane.xlu0 %1412 }
 0xa77   :  { %4687 = vrcp.f32 %v1413_v61 }
 0xa7a   :  { %v1422_v62 = vpop.permute.xlu0 %1421 }
 0xa7b   :  { %4431 = vmatpush3.msra.mxu0 %v1422_v62 }
 0xa7c   :  { %4440 = vmatprep.subr.mxu0 %v1608_v39 }
 0xa7e   :  { %v1584_v13 = vpop.permute.xlu0 %1583 }
 0xa7f   :  { %v1600_v17 = vsel %vm1599_vm4, %v1597_v15, %v1584_v13 }
 0xa80   :  { %v4686_v63 = vpop.eup %4685 }
 0xa81   :  { %v1415_v0 = vmul.f32 %v4686_v63, %v4682_v37  ;;  %v4125_v37 = vld [vmem:[%s5681_s8] ss:$0 sm:$0xff] }
 0xa83   :  { %4118 = vst.msk [vmem:[%s5694_s21 + $0x30] sm:$0xff] %vm218_vm2, %v1415_v0  ;;  %4433 = vmatmul.mubr.msk.f32.vlgmr.msra.gmra.mxu0 %vm218_vm2, %v1415_v0 }
 0xa84   :  { %v4688_v1 = vpop.eup %4687  ;;  %4441 = vmatpush3.msra.mxu0 %v1608_v39  ;;  %v1858_v39 = vld [vmem:[%s5685_s12 + $0x28] sm:$0xff] }
 0xa85   :  { %v1417_v2 = vmul.f32 %v4688_v1, %v4684_v55  ;;  %4442 = vmatprep.subr.mxu0 %v1607_v3  ;;  %v4126_v55 = vld [vmem:[%s5682_s9] ss:$0 sm:$0xff]  ;;  %v1860_v1 = vld [vmem:[%s5685_s12 + $0x38] sm:$0xff] }
 0xa86   :  { %4443 = vmatpush3.msra.mxu0 %v1607_v3  ;;  %v1857_v3 = vld [vmem:[%s5685_s12 + $0x20] sm:$0xff] }
 0xa87   :  { %4119 = vst.msk [vmem:[%s5694_s21 + $0x38] sm:$0xff] %vm218_vm2, %v1417_v2  ;;  %4438 = vmatmul.mubr.msk.f32.vlgmr.msra.gmra.mxu1 %vm218_vm2, %v1417_v2  ;;  %4444 = vmatprep.subr.mxu0 %v1606_v4  ;;  %v1859_v2 = vld [vmem:[%s5685_s12 + $0x30] sm:$0xff] }
 0xa88   :  { %4445 = vmatpush3.msra.mxu0 %v1606_v4  ;;  %v1856_v4 = vld [vmem:[%s5685_s12 + $0x18] sm:$0xff] }
 0xa89   :  { %4446 = vmatprep.subr.mxu0 %v1605_v5 }
 0xa8a   :  { %4447 = vmatpush3.msra.mxu0 %v1605_v5  ;;  %v1855_v5 = vld [vmem:[%s5685_s12 + $0x10] sm:$0xff] }
 0xa8b   :  { %4462 = vmatprep.subr.mxu0 %v1860_v1 }
 0xb43   :  { %v1493_v6 = vpop.f32.mrf.mxu0 }
 0xb44   :  { %1591 = vrot.lane.b32.xlu0 %v1493_v6, %s5723_s24  ;;  %v1854_v6 = vld [vmem:[%s5685_s12 + $0x8] sm:$0xff] }
 0xb45   :  { %v4434_v7 = vpop.f32.mrf.mxu0 }
 0xb46   :  { %v1853_v7 = vld [vmem:[%s5685_s12] sm:$0xff] }
 0xb47   :  { %v1569_v8 = vpop.f32.mrf.mxu1 }
 0xb48   :  { %1593 = vrot.lane.b32.xlu1 %v1569_v8, %s5723_s24  ;;  %v4127_v8 = vld [vmem:[%s5684_s11] ss:$0 sm:$0xff] }
 0xb49   :  { %v4439_v9 = vpop.f32.mrf.mxu1 }
 0xbb6   :  { %v1592_v18 = vpop.permute.xlu0 %1591 }
 0xbb7   :  { %v1603_v19 = vsel %vm1602_vm3, %v1600_v17, %v1592_v18 }
 0xbb8   :  { %4448 = vmatprep.mubr.msk.f32.mxu0 %vm77_vm0, %v1603_v19 }
 0xbba   :  { %v1594_v22 = vpop.permute.xlu1 %1593 }
 0xbbb   :  { %v1604_v23 = vsel %vm1602_vm3, %v1601_v21, %v1594_v22 }
 0xbbc   :  { %4449 = vmatmul.mubr.msk.f32.vlgmr.msra.gmra.mxu0 %vm77_vm0, %v1604_v23 }
 0xbbd   :  { %4463 = vmatpush3.msra.mxu0 %v1860_v1  ;;  %v4133_v1 = vld [vmem:[%s5687_s14] ss:$0 sm:$0xff] }
 0xbbe   :  { %4464 = vmatprep.subr.mxu0 %v1859_v2 }
 0xbbf   :  { %4465 = vmatpush3.msra.mxu0 %v1859_v2 }
 0xbc0   :  { %4466 = vmatprep.subr.mxu0 %v1858_v39 }
 0xbc1   :  { %4467 = vmatpush3.msra.mxu0 %v1858_v39 }
 0xbc2   :  { %4468 = vmatprep.subr.mxu0 %v1857_v3 }
 0xbc3   :  { %4469 = vmatpush3.msra.mxu0 %v1857_v3  ;;  %v4134_v3 = vld [vmem:[%s5688_s15] ss:$0 sm:$0xff] }
 0xbc4   :  { %4470 = vmatprep.subr.mxu0 %v1856_v4 }
 0xbc5   :  { %4471 = vmatpush3.msra.mxu0 %v1856_v4 }
 0xbc6   :  { %4472 = vmatprep.subr.mxu0 %v1855_v5 }
 0xbc7   :  { %4473 = vmatpush3.msra.mxu0 %v1855_v5 }
 0xbc8   :  { %4474 = vmatprep.subr.mxu0 %v1854_v6 }
 0xbc9   :  { %4475 = vmatpush3.msra.mxu0 %v1854_v6 }
 0xbca   :  { %4476 = vmatprep.subr.mxu0 %v1853_v7 }
 0xbcb   :  { %4477 = vmatpush3.msra.mxu0 %v1853_v7 }
 0xbcc   :  { %4502 = vmatprep.subr.mxu0 %v4793_v34 }
 0xc7c   :  { %v4450_v24 = vpop.f32.mrf.mxu0 }
 0xc7d   :  { %v1694_v25 = vadd.f32 %v4450_v24, %v4122_v12 }
 0xc7e   :  { %v1688_v26 = vpop.f32.mrf.mxu0 }
 0xc7f   :  { %v1689_v27 = vadd.f32 %v4122_v12, %v1688_v26  ;;  %v1698_v28 = vadd.f32 %v1694_v25, %v4968_v33 }
 0xc81   :  { %v1704_v29 = vsel %vm77_vm0, %v1698_v28, 0.0  ;;  %v1697_v14 = vadd.f32 %v1689_v27, %v4959_v31  ;;  %v1746_v31 = vld [vmem:[%s5683_s10 + $0x18] sm:$0xff] }
 0xc82   :  { %1705 = vadd.xlane.f32.xlu1 %v1704_v29  ;;  %4451 = vmatprep.subr.mxu1 %v1746_v31 }
 0xc83   :  { %v1701_v30 = vsel %vm77_vm0, %v1697_v14, 0.0  ;;  %4452 = vmatpush3.msra.mxu1 %v1746_v31 }
 0xc84   :  { %1702 = vadd.xlane.f32.xlu0 %v1701_v30  ;;  %4453 = vmatprep.subr.mxu1 %v1745_v46 }
 0xc85   :  { %4454 = vmatpush3.msra.mxu1 %v1745_v46 }
 0xc86   :  { %4455 = vmatprep.subr.mxu1 %v1744_v47 }
 0xc87   :  { %4456 = vmatpush3.msra.mxu1 %v1744_v47 }
 0xc88   :  { %4457 = vmatprep.subr.mxu1 %v1743_v49 }
 0xc89   :  { %4458 = vmatpush3.msra.mxu1 %v1743_v49 }
 0xd0b   :  { %v1706_v32 = vpop.xlane.xlu1 %1705 }
 0xd0c   :  { %v1708_v35 = vmul.f32 0.03125, %v1706_v32  ;;  %v4130_v32 = vld [vmem:[%s5686_s13] ss:$0 sm:$0xff] }
 0xd0d   :  { %v1703_v36 = vpop.xlane.xlu0 %1702 }
 0xd0e   :  { %v1707_v38 = vmul.f32 0.03125, %v1703_v36  ;;  %v1710_v40 = vsub.f32 %v1698_v28, %v1708_v35 }
 0xd10   :  { %v1709_v41 = vsub.f32 %v1697_v14, %v1707_v38  ;;  %v1712_v45 = vmul.f32 %v1710_v40, %v1710_v40 }
 0xd12   :  { %v1711_v42 = vmul.f32 %v1709_v41, %v1709_v41  ;;  %v1716_v33 = vsel %vm77_vm0, %v1712_v45, 0.0 }
 0xd14   :  { %v1713_v44 = vsel %vm77_vm0, %v1711_v42, 0.0 }
 0xd15   :  { %1714 = vadd.xlane.f32.xlu0 %v1713_v44 }
 0xd19   :  { %1717 = vadd.xlane.f32.xlu0 %v1716_v33 }
 0xd9e   :  { %v1715_v50 = vpop.xlane.xlu0 %1714 }
 0xd9f   :  { %v1719_v51 = vmul.f32 0.03125, %v1715_v50 }
 0xda1   :  { %v1721_v52 = vadd.f32 1e-12, %v1719_v51 }
 0xda2   :  { %v1718_v53 = vpop.xlane.xlu0 %1717 }
 0xda3   :  { %4689 = vrsqrt.f32 %v1721_v52  ;;  %v1720_v54 = vmul.f32 0.03125, %v1718_v53 }
 0xda5   :  { %v1722_v56 = vadd.f32 1e-12, %v1720_v54 }
 0xda7   :  { %4691 = vrsqrt.f32 %v1722_v56  ;;  %v4140_v56 = vld [vmem:[%s5736_s2 + $0x38] sm:$0xff] }
 0xda8   :  { %4481 = vmatprep.subr.mxu1 %v4140_v56 }
 0xdb0   :  { %v4690_v58 = vpop.eup %4689 }
 0xdb1   :  { %v1725_v59 = vmul.f32 %v4690_v58, %v1709_v41  ;;  %v4139_v58 = vld [vmem:[%s5736_s2 + $0x30] sm:$0xff] }
 0xdb3   :  { %v1733_v57 = vmul.f32 %v4125_v37, %v1725_v59  ;;  %v4137_v59 = vld [vmem:[%s5736_s2 + $0x20] sm:$0xff] }
 0xdb4   :  { %v4692_v60 = vpop.eup %4691 }
 0xdb5   :  { %v1726_v61 = vmul.f32 %v4692_v60, %v1710_v40  ;;  %v5233_v62 = vadd.f32 %v4126_v55, %v1733_v57 }
 0xdb7   :  { %v1734_v63 = vmul.f32 %v4125_v37, %v1726_v61  ;;  %4459 = vmatprep.mubr.msk.f32.mxu1 %vm77_vm0, %v5233_v62  ;;  %v4138_v37 = vld [vmem:[%s5736_s2 + $0x28] sm:$0xff] }
 0xdb9   :  { %v1742_v0 = vadd.f32 %v4126_v55, %v1734_v63 }
 0xdbb   :  { %4460 = vmatmul.mubr.msk.f32.vlgmr.msra.gmra.mxu1 %vm77_vm0, %v1742_v0 }
 0xdbc   :  { %4482 = vmatpush3.msra.mxu1 %v4140_v56 }
 0xdbd   :  { %4483 = vmatprep.subr.mxu1 %v4139_v58 }
 0xdbe   :  { %4484 = vmatpush3.msra.mxu1 %v4139_v58 }
 0xdbf   :  { %4485 = vmatprep.subr.mxu1 %v4138_v37 }
 0xdc0   :  { %4486 = vmatpush3.msra.mxu1 %v4138_v37 }
 0xdc1   :  { %4487 = vmatprep.subr.mxu1 %v4137_v59 }
 0xdc2   :  { %4488 = vmatpush3.msra.mxu1 %v4137_v59  ;;  %v5391_v59 = vld [vmem:[%s5740_s30] ss:$0 sm:$0xff] }
 0xdc3   :  { %4492 = vmatprep.subr.mxu1 %v4793_v34 }
 0xe7b   :  { %v4461_v9 = vpop.f32.mrf.mxu1 }
 0xe7c   :  { %v1832_v10 = vadd.f32 %v4461_v9, %v4127_v8  ;;  %v4142_v9 = vld [vmem:[%s5739_s29 + $0x1] ss:$0 sm:$0xff]  ;;  %s5743_s29 = smov 88  }
 0xe7d   :  { %v1826_v11 = vpop.f32.mrf.mxu1 }
 0xe7e   :  { %v1838_v13 = vmul.f32 0.044715, %v1832_v10  ;;  %v1827_v15 = vadd.f32 %v4127_v8, %v1826_v11  ;;  %v1836_v29 = vmul.f32 0.5, %v1832_v10 }
 0xe80   :  { %v1840_v16 = vmul.f32 %v1838_v13, %v1832_v10  ;;  %v1837_v17 = vmul.f32 0.044715, %v1827_v15  ;;  %v1835_v27 = vmul.f32 0.5, %v1827_v15 }
 0xe82   :  { %v1842_v18 = vmul.f32 %v1840_v16, %v1832_v10  ;;  %v1839_v19 = vmul.f32 %v1837_v17, %v1827_v15 }
 0xe84   :  { %v1844_v20 = vadd.f32 %v1842_v18, %v1832_v10  ;;  %v1841_v21 = vmul.f32 %v1839_v19, %v1827_v15 }
 0xe86   :  { %v1846_v22 = vmul.f32 0.7978846, %v1844_v20  ;;  %v1843_v23 = vadd.f32 %v1841_v21, %v1827_v15 }
 0xe88   :  { %4693 = vtanh.f32 %v1846_v22  ;;  %v1845_v12 = vmul.f32 0.7978846, %v1843_v23 }
 0xe8a   :  { %4695 = vtanh.f32 %v1845_v12 }
 0xe95   :  { %v4694_v24 = vpop.eup %4693 }
 0xe96   :  { %v1850_v26 = vadd.f32 1.0, %v4694_v24 }
 0xe97   :  { %v4696_v25 = vpop.eup %4695 }
 0xe98   :  { %v1849_v28 = vadd.f32 1.0, %v4696_v25  ;;  %v1852_v30 = vmul.f32 %v1850_v26, %v1836_v29 }
 0xe9a   :  { %v1851_v14 = vmul.f32 %v1849_v28, %v1835_v27 }
 0xe9c   :  { %4478 = vmatprep.mubr.msk.f32.mxu0 %vm1868_vm5, %v1851_v14 }
 0xe9d   :  { %4479 = vmatmul.mubr.msk.f32.vlgmr.msra.gmra.mxu0 %vm1868_vm5, %v1852_v30 }
 0xe9e   :  { %4504 = vmatprep.mubr.msk.f32.mxu0 %vm4794_vm1, %v4793_v34 }
 0xf5d   :  { %v4480_v35 = vpop.f32.mrf.mxu0 }
 0xf5e   :  { %v1947_v36 = vadd.f32 %v4480_v35, %v4130_v32 }
 0xf5f   :  { %v1941_v38 = vpop.f32.mrf.mxu0 }
 0xf60   :  { %v1942_v40 = vadd.f32 %v4130_v32, %v1941_v38  ;;  %v1951_v41 = vadd.f32 %v1947_v36, %v1742_v0 }
 0xf62   :  { %v1957_v42 = vsel %vm77_vm0, %v1951_v41, 0.0  ;;  %v1950_v44 = vadd.f32 %v1942_v40, %v5233_v62 }
 0xf63   :  { %1958 = vadd.xlane.f32.xlu1 %v1957_v42 }
 0xf64   :  { %v1954_v45 = vsel %vm77_vm0, %v1950_v44, 0.0 }
 0xf65   :  { %1955 = vadd.xlane.f32.xlu0 %v1954_v45 }
 0xfec   :  { %v1959_v33 = vpop.xlane.xlu1 %1958 }
 0xfed   :  { %v1961_v31 = vmul.f32 0.03125, %v1959_v33 }
 0xfee   :  { %v1956_v46 = vpop.xlane.xlu0 %1955 }
 0xfef   :  { %v1963_v47 = vsub.f32 %v1951_v41, %v1961_v31  ;;  %v1960_v49 = vmul.f32 0.03125, %v1956_v46 }
 0xff1   :  { %v1962_v50 = vsub.f32 %v1950_v44, %v1960_v49  ;;  %v1965_v51 = vmul.f32 %v1963_v47, %v1963_v47 }
 0xff3   :  { %v1969_v52 = vsel %vm77_vm0, %v1965_v51, 0.0  ;;  %v1964_v53 = vmul.f32 %v1962_v50, %v1962_v50 }
 0xff4   :  { %1970 = vadd.xlane.f32.xlu1 %v1969_v52 }
 0xff5   :  { %v1966_v54 = vsel %vm77_vm0, %v1964_v53, 0.0 }
 0xff6   :  { %1967 = vadd.xlane.f32.xlu0 %v1966_v54 }
0x107d   :  { %v1971_v55 = vpop.xlane.xlu1 %1970 }
0x107e   :  { %v1973_v57 = vmul.f32 0.03125, %v1971_v55 }
0x107f   :  { %v1968_v60 = vpop.xlane.xlu0 %1967 }
0x1080   :  { %v1975_v61 = vadd.f32 1e-12, %v1973_v57  ;;  %v1972_v62 = vmul.f32 0.03125, %v1968_v60 }
0x1082   :  { %4697 = vrsqrt.f32 %v1975_v61  ;;  %v1974_v63 = vadd.f32 1e-12, %v1972_v62 }
0x1084   :  { %4699 = vrsqrt.f32 %v1974_v63  ;;  %v5398_v63 = vld [vmem:[%s5740_s30 + $0x1] ss:$0 sm:$0xff]  ;;  %s5753_s30 = smov 16  }
0x108f   :  { %v4698_v0 = vpop.eup %4697 }
0x1090   :  { %v1979_v2 = vmul.f32 %v4698_v0, %v1963_v47 }
0x1091   :  { %v4700_v39 = vpop.eup %4699 }
0x1092   :  { %v1978_v4 = vmul.f32 %v4700_v39, %v1962_v50  ;;  %v1987_v5 = vmul.f32 %v4133_v1, %v1979_v2 }
0x1094   :  { %v1986_v6 = vmul.f32 %v4133_v1, %v1978_v4  ;;  %v5297_v7 = vadd.f32 %v4134_v3, %v1987_v5 }
0x1096   :  { %v5299_v8 = vadd.f32 %v4134_v3, %v1986_v6  ;;  %4136 = vst.msk [vmem:[%s5693_s20 + $0x18] sm:$0xff] %vm77_vm0, %v5297_v7 }
0x1098   :  { %4135 = vst.msk [vmem:[%s5693_s20 + $0x10] sm:$0xff] %vm77_vm0, %v5299_v8  ;;  %4489 = vmatprep.mubr.msk.f32.mxu1 %vm77_vm0, %v5299_v8 }
0x1099   :  { %4490 = vmatmul.mubr.msk.f32.vlgmr.msra.gmra.mxu1 %vm77_vm0, %v5297_v7 }
0x109a   :  { %4494 = vmatprep.mubr.msk.f32.mxu1 %vm4794_vm1, %v4793_v34 }
0x1159   :  { %v4491_v10 = vpop.f32.mrf.mxu1 }
0x115a   :  { %v5320_v11 = vadd.f32 %v4491_v10, %v4142_v9 }
0x115b   :  { %v2084_v13 = vpop.f32.mrf.mxu1 }
0x115c   :  { %v5322_v15 = vadd.f32 %v4142_v9, %v2084_v13  ;;  %2171 = vrot.lane.b32.xlu1 %v5320_v11, %s4795_s3 }
0x115e   :  { %2094 = vrot.lane.b32.xlu0 %v5322_v15, %s4795_s3  ;;  %s5744_s3 = smov 120  }
0x11ce   :  { %v2172_v17 = vpop.permute.xlu1 %2171 }
0x11d0   :  { %v2095_v16 = vpop.permute.xlu0 %2094 }
0x11d1   :  { %4493 = vmatpush3.xpose.msk.msra.mxu1 %vm218_vm2, %v2095_v16 }
0x11d2   :  { %4497 = vmatprep.subr.mxu1 %v4793_v34 }
0x11d4   :  { %4495 = vmatmul.mubr.msk.f32.vlgmr.msra.gmra.mxu1 %vm218_vm2, %v5322_v15 }
0x11d5   :  { %4498 = vmatpush3.xpose.msk.msra.mxu1 %vm218_vm2, %v2172_v17  ;;  %4499 = vmatprep.mubr.msk.f32.mxu1 %vm4794_vm1, %v4793_v34 }
0x11d6   :  { %4507 = vmatprep.subr.mxu1 %v4793_v34 }
0x11d8   :  { %4500 = vmatmul.mubr.msk.f32.vlgmr.msra.gmra.mxu1 %vm218_vm2, %v5320_v11 }
0x11d9   :  { %4509 = vmatprep.mubr.msk.f32.mxu1 %vm4794_vm1, %v4793_v34 }
0x1294   :  { %v2166_v18 = vpop.f32.mrf.mxu1 }
0x1295   :  { %v2247_v19 = vmul.f32 0.35355338, %v2166_v18 }
0x1296   :  { %v4496_v20 = vpop.f32.mrf.mxu1 }
0x1297   :  { %v2249_v21 = vadd.f32 %v5009_v43, %v2247_v19 }
0x1298   :  { %v2243_v22 = vpop.f32.mrf.mxu1 }
0x1299   :  { %v2248_v23 = vmul.f32 0.35355338, %v2243_v22  ;;  %v2251_v12 = vsel %vm218_vm2, %v2249_v21, -inf }
0x129a   :  { %2252 = vmax.xlane.f32.xlu1 %v2251_v12  ;;  %v4501_v24 = vpop.f32.mrf.mxu1 }
0x129b   :  { %v2250_v25 = vadd.f32 %v5015_v48, %v2248_v23 }
0x129d   :  { %v2254_v26 = vsel %vm218_vm2, %v2250_v25, -inf }
0x129e   :  { %2255 = vmax.xlane.f32.xlu0 %v2254_v26 }
0x12ab   :  { %2352 = vrot.lane.b32.xlu1 %v5320_v11, %s4796_s5 }
0x12af   :  { %2430 = vrot.lane.b32.xlu1 %v5322_v15, %s5743_s29 }
0x12b3   :  { %2508 = vrot.lane.b32.xlu1 %v5320_v11, %s5743_s29  ;;  %s5747_s29 = smov 112  }
0x1323   :  { %v2253_v43 = vpop.xlane.xlu1 %2252 }
0x1324   :  { %v2257_v27 = vsub.f32 %v2249_v21, %v2253_v43 }
0x1326   :  { %v2259_v28 = vmul.f32 1.442695, %v2257_v27 }
0x1327   :  { %v2353_v29 = vpop.permute.xlu1 %2352  ;;  %v2256_v14 = vpop.xlane.xlu0 %2255 }
0x1328   :  { %4701 = vpow2.f32 %v2259_v28  ;;  %v2258_v30 = vsub.f32 %v2250_v25, %v2256_v14  ;;  %4508 = vmatpush3.msra.mxu1 %v2353_v29 }
0x1329   :  { %4517 = vmatprep.subr.mxu1 %v4793_v34 }
0x132a   :  { %v2261_v48 = vmul.f32 1.442695, %v2258_v30 }
0x132b   :  { %v2431_v40 = vpop.permute.xlu1 %2430 }
0x132c   :  { %4703 = vpow2.f32 %v2261_v48 }
0x132f   :  { %v2509_v41 = vpop.permute.xlu1 %2508 }
0x1335   :  { %v4702_v32 = vpop.eup %4701 }
0x1336   :  { %v2263_v35 = vsel %vm218_vm2, %v4702_v32, 0.0 }
0x1337   :  { %2264 = vadd.xlane.f32.xlu0 %v2263_v35 }
0x1339   :  { %v4704_v36 = vpop.eup %4703 }
0x133a   :  { %v2266_v38 = vsel %vm218_vm2, %v4704_v36, 0.0 }
0x133b   :  { %2267 = vadd.xlane.f32.xlu1 %v2266_v38 }
0x134c   :  { %2506 = vrot.lane.b32.xlu1 %v5320_v11, %s5744_s3 }
0x134d   :  { %2276 = vrot.lane.b32.xlu0 %v5322_v15, %s4796_s5  ;;  %s5748_s5 = smov 48  }
0x1351   :  { %2428 = vrot.lane.b32.xlu0 %v5322_v15, %s5744_s3 }
0x13c0   :  { %v2265_v42 = vpop.xlane.xlu0 %2264 }
0x13c1   :  { %4705 = vrcp.f32 %v2265_v42 }
0x13c4   :  { %v2268_v44 = vpop.xlane.xlu1 %2267  ;;  %v2277_v45 = vpop.permute.xlu0 %2276 }
0x13c5   :  { %4707 = vrcp.f32 %v2268_v44  ;;  %4503 = vmatpush3.msra.mxu0 %v2277_v45 }
0x13c6   :  { %4512 = vmatprep.subr.mxu0 %v4793_v34 }
0x13c8   :  { %v2429_v49 = vpop.permute.xlu0 %2428  ;;  %v2507_v50 = vpop.permute.xlu1 %2506 }
0x13ce   :  { %v4706_v33 = vpop.eup %4705 }
0x13cf   :  { %v2270_v31 = vmul.f32 %v4706_v33, %v4702_v32 }
0x13d1   :  { %4149 = vst.msk [vmem:[%s5694_s21 + $0x40] sm:$0xff] %vm218_vm2, %v2270_v31  ;;  %4505 = vmatmul.mubr.msk.f32.vlgmr.msra.gmra.mxu0 %vm218_vm2, %v2270_v31 }
0x13d2   :  { %v4708_v46 = vpop.eup %4707  ;;  %4513 = vmatpush3.xpose.msk.msra.mxu0 %vm218_vm2, %v2431_v40  ;;  %4514 = vmatprep.mubr.msk.f32.mxu0 %vm4794_vm1, %v4793_v34 }
0x13d3   :  { %v2272_v47 = vmul.f32 %v4708_v46, %v4704_v36  ;;  %4522 = vmatprep.subr.mxu0 %v4793_v34 }
0x13d5   :  { %4150 = vst.msk [vmem:[%s5694_s21 + $0x48] sm:$0xff] %vm218_vm2, %v2272_v47  ;;  %4510 = vmatmul.mubr.msk.f32.vlgmr.msra.gmra.mxu1 %vm218_vm2, %v2272_v47  ;;  %4515 = vmatmul.mubr.msk.f32.vlgmr.msra.gmra.mxu0 %vm218_vm2, %v2429_v49 }
0x13d6   :  { %4518 = vmatpush3.xpose.msk.msra.mxu1 %vm218_vm2, %v2509_v41  ;;  %4519 = vmatprep.mubr.msk.f32.mxu1 %vm4794_vm1, %v4793_v34 }
0x13d7   :  { %4527 = vmatprep.subr.mxu1 %v4793_v34  ;;  %4524 = vmatprep.mubr.msk.f32.mxu0 %vm4794_vm1, %v4793_v34 }
0x13d9   :  { %4520 = vmatmul.mubr.msk.f32.vlgmr.msra.gmra.mxu1 %vm218_vm2, %v2507_v50 }
0x13da   :  { %4529 = vmatprep.mubr.msk.f32.mxu1 %vm4794_vm1, %v4793_v34 }
0x1491   :  { %v5384_v51 = vpop.f32.mrf.mxu0 }
0x1493   :  { %v4506_v52 = vpop.f32.mrf.mxu0 }
0x1495   :  { %v5386_v53 = vpop.f32.mrf.mxu1  ;;  %v2502_v54 = vpop.f32.mrf.mxu0 }
0x1496   :  { %v2584_v56 = vmul.f32 0.35355338, %v2502_v54 }
0x1497   :  { %v4511_v58 = vpop.f32.mrf.mxu1  ;;  %v4516_v37 = vpop.f32.mrf.mxu0 }
0x1498   :  { %v2586_v55 = vadd.f32 %v5391_v59, %v2584_v56 }
0x1499   :  { %v2580_v57 = vpop.f32.mrf.mxu1 }
0x149a   :  { %v2585_v60 = vmul.f32 0.35355338, %v2580_v57  ;;  %v2588_v61 = vsel %vm218_vm2, %v2586_v55, -inf }
0x149b   :  { %2589 = vmax.xlane.f32.xlu0 %v2588_v61  ;;  %v4521_v62 = vpop.f32.mrf.mxu1 }
0x149c   :  { %v2587_v0 = vadd.f32 %v5398_v63, %v2585_v60 }
0x149e   :  { %v2591_v1 = vsel %vm218_vm2, %v2587_v0, -inf }
0x149f   :  { %2592 = vmax.xlane.f32.xlu1 %v2591_v1 }
0x14b0   :  { %2689 = vrot.lane.b32.xlu1 %v5320_v11, %s5745_s0 }
0x14b1   :  { %2613 = vrot.lane.b32.xlu0 %v5322_v15, %s5745_s0 }
0x14b4   :  { %2767 = vrot.lane.b32.xlu1 %v5322_v15, %s5746_s6 }
0x14b8   :  { %2845 = vrot.lane.b32.xlu1 %v5320_v11, %s5746_s6  ;;  %s5751_s6 = smov 40  }
0x14bc   :  { %2843 = vrot.lane.b32.xlu1 %v5320_v11, %s5747_s29 }
0x1524   :  { %v2590_v2 = vpop.xlane.xlu0 %2589 }
0x1525   :  { %v2594_v39 = vsub.f32 %v2586_v55, %v2590_v2 }
0x1527   :  { %v2596_v3 = vmul.f32 1.442695, %v2594_v39 }
0x1528   :  { %v2614_v4 = vpop.permute.xlu0 %2613  ;;  %v2593_v5 = vpop.xlane.xlu1 %2592 }
0x1529   :  { %4709 = vpow2.f32 %v2596_v3  ;;  %v2595_v6 = vsub.f32 %v2587_v0, %v2593_v5  ;;  %4523 = vmatpush3.msra.mxu0 %v2614_v4 }
0x152a   :  { %4532 = vmatprep.subr.mxu0 %v4793_v34 }
0x152b   :  { %v2598_v9 = vmul.f32 1.442695, %v2595_v6 }
0x152c   :  { %v2690_v10 = vpop.permute.xlu1 %2689 }
0x152d   :  { %4711 = vpow2.f32 %v2598_v9  ;;  %4528 = vmatpush3.msra.mxu1 %v2690_v10 }
0x152e   :  { %4537 = vmatprep.subr.mxu1 %v4793_v34 }
0x1530   :  { %v2768_v21 = vpop.permute.xlu1 %2767 }
0x1534   :  { %v2846_v24 = vpop.permute.xlu1 %2845 }
0x1536   :  { %v4710_v13 = vpop.eup %4709 }
0x1537   :  { %v2600_v16 = vsel %vm218_vm2, %v4710_v13, 0.0 }
0x1538   :  { %2601 = vadd.xlane.f32.xlu0 %v2600_v16  ;;  %v2844_v43 = vpop.permute.xlu1 %2843 }
0x153a   :  { %v4712_v17 = vpop.eup %4711 }
0x153b   :  { %v2603_v18 = vsel %vm218_vm2, %v4712_v17, 0.0 }
0x153c   :  { %2604 = vadd.xlane.f32.xlu0 %v2603_v18 }
0x1552   :  { %2765 = vrot.lane.b32.xlu0 %v5322_v15, %s5747_s29  ;;  %s5752_s29 = smov 8  }
0x15c1   :  { %v2602_v19 = vpop.xlane.xlu0 %2601 }
0x15c2   :  { %4713 = vrcp.f32 %v2602_v19 }
0x15c5   :  { %v2605_v20 = vpop.xlane.xlu0 %2604 }
0x15c6   :  { %4715 = vrcp.f32 %v2605_v20 }
0x15c9   :  { %v2766_v26 = vpop.permute.xlu0 %2765 }
0x15cf   :  { %v4714_v22 = vpop.eup %4713 }
0x15d0   :  { %v2607_v23 = vmul.f32 %v4714_v22, %v4710_v13 }
0x15d2   :  { %4157 = vst.msk [vmem:[%s5694_s21 + $0x50] sm:$0xff] %vm218_vm2, %v2607_v23  ;;  %4525 = vmatmul.mubr.msk.f32.vlgmr.msra.gmra.mxu0 %vm218_vm2, %v2607_v23 }
0x15d3   :  { %v4716_v12 = vpop.eup %4715  ;;  %4533 = vmatpush3.xpose.msk.msra.mxu0 %vm218_vm2, %v2768_v21  ;;  %4534 = vmatprep.mubr.msk.f32.mxu0 %vm4794_vm1, %v4793_v34 }
0x15d4   :  { %v2609_v25 = vmul.f32 %v4716_v12, %v4712_v17  ;;  %4542 = vmatprep.subr.mxu0 %v4793_v34 }
0x15d6   :  { %4158 = vst.msk [vmem:[%s5694_s21 + $0x58] sm:$0xff] %vm218_vm2, %v2609_v25  ;;  %4530 = vmatmul.mubr.msk.f32.vlgmr.msra.gmra.mxu1 %vm218_vm2, %v2609_v25  ;;  %4535 = vmatmul.mubr.msk.f32.vlgmr.msra.gmra.mxu0 %vm218_vm2, %v2766_v26 }
0x15d7   :  { %4538 = vmatpush3.xpose.msk.msra.mxu1 %vm218_vm2, %v2846_v24  ;;  %4539 = vmatprep.mubr.msk.f32.mxu1 %vm4794_vm1, %v4793_v34 }
0x15d8   :  { %4547 = vmatprep.subr.mxu1 %v4793_v34  ;;  %4544 = vmatprep.mubr.msk.f32.mxu0 %vm4794_vm1, %v4793_v34 }
0x15da   :  { %4540 = vmatmul.mubr.msk.f32.vlgmr.msra.gmra.mxu1 %vm218_vm2, %v2844_v43 }
0x15db   :  { %4549 = vmatprep.mubr.msk.f32.mxu1 %vm4794_vm1, %v4793_v34 }
0x1692   :  { %v5442_v27 = vpop.f32.mrf.mxu0 }
0x1694   :  { %v4526_v28 = vpop.f32.mrf.mxu0 }
0x1696   :  { %v5444_v29 = vpop.f32.mrf.mxu1  ;;  %v2839_v14 = vpop.f32.mrf.mxu0 }
0x1697   :  { %v2921_v30 = vmul.f32 0.35355338, %v2839_v14 }
0x1698   :  { %v4531_v48 = vpop.f32.mrf.mxu1  ;;  %v4536_v32 = vpop.f32.mrf.mxu0 }
0x1699   :  { %v2923_v35 = vadd.f32 %v5391_v59, %v2921_v30 }
0x169a   :  { %v2917_v36 = vpop.f32.mrf.mxu1 }
0x169b   :  { %v2922_v38 = vmul.f32 0.35355338, %v2917_v36  ;;  %v2925_v40 = vsel %vm218_vm2, %v2923_v35, -inf }
0x169c   :  { %2926 = vmax.xlane.f32.xlu0 %v2925_v40  ;;  %v4541_v41 = vpop.f32.mrf.mxu1  ;;  %v4179_v40 = vld [vmem:[%s5741_s4 + $0x30] sm:$0xff] }
0x169d   :  { %v2924_v42 = vadd.f32 %v5398_v63, %v2922_v38  ;;  %v4178_v41 = vld [vmem:[%s5741_s4 + $0x28] sm:$0xff] }
0x169f   :  { %v2928_v44 = vsel %vm218_vm2, %v2924_v42, -inf }
0x16a0   :  { %2929 = vmax.xlane.f32.xlu1 %v2928_v44 }
0x16b1   :  { %3026 = vrot.lane.b32.xlu1 %v5320_v11, %s5748_s5 }
0x16b2   :  { %2950 = vrot.lane.b32.xlu0 %v5322_v15, %s5748_s5 }
0x16b5   :  { %3104 = vrot.lane.b32.xlu1 %v5322_v15, %s5749_s25 }
0x16b9   :  { %3182 = vrot.lane.b32.xlu1 %v5320_v11, %s5749_s25 }
0x16bd   :  { %3180 = vrot.lane.b32.xlu1 %v5320_v11, %s5750_s27 }
0x1725   :  { %v2927_v45 = vpop.xlane.xlu0 %2926 }
0x1726   :  { %v2931_v33 = vsub.f32 %v2923_v35, %v2927_v45 }
0x1728   :  { %v2933_v31 = vmul.f32 1.442695, %v2931_v33 }
0x1729   :  { %v2951_v46 = vpop.permute.xlu0 %2950  ;;  %v2930_v47 = vpop.xlane.xlu1 %2929 }
0x172a   :  { %4717 = vpow2.f32 %v2933_v31  ;;  %v2932_v49 = vsub.f32 %v2924_v42, %v2930_v47  ;;  %4543 = vmatpush3.msra.mxu0 %v2951_v46  ;;  %v4177_v42 = vld [vmem:[%s5741_s4 + $0x20] sm:$0xff] }
0x172b   :  { %4552 = vmatprep.subr.mxu0 %v4793_v34 }
0x172c   :  { %v2935_v50 = vmul.f32 1.442695, %v2932_v49 }
0x172d   :  { %v3027_v52 = vpop.permute.xlu1 %3026 }
0x172e   :  { %4719 = vpow2.f32 %v2935_v50  ;;  %4548 = vmatpush3.msra.mxu1 %v3027_v52 }
0x172f   :  { %4557 = vmatprep.subr.mxu1 %v4793_v34 }
0x1731   :  { %v3105_v60 = vpop.permute.xlu1 %3104 }
0x1735   :  { %v3183_v1 = vpop.permute.xlu1 %3182 }
0x1737   :  { %v4718_v54 = vpop.eup %4717 }
0x1738   :  { %v2937_v56 = vsel %vm218_vm2, %v4718_v54, 0.0 }
0x1739   :  { %2938 = vadd.xlane.f32.xlu0 %v2937_v56  ;;  %v3181_v3 = vpop.permute.xlu1 %3180 }
0x173b   :  { %v4720_v58 = vpop.eup %4719 }
0x173c   :  { %v2940_v37 = vsel %vm218_vm2, %v4720_v58, 0.0 }
0x173d   :  { %2941 = vadd.xlane.f32.xlu0 %v2940_v37 }
0x1753   :  { %3102 = vrot.lane.b32.xlu0 %v5322_v15, %s5750_s27 }
0x17c2   :  { %v2939_v55 = vpop.xlane.xlu0 %2938 }
0x17c3   :  { %4721 = vrcp.f32 %v2939_v55 }
0x17c6   :  { %v2942_v57 = vpop.xlane.xlu0 %2941 }
0x17c7   :  { %4723 = vrcp.f32 %v2942_v57 }
0x17ca   :  { %v3103_v39 = vpop.permute.xlu0 %3102 }
0x17d0   :  { %v4722_v61 = vpop.eup %4721 }
0x17d1   :  { %v2944_v62 = vmul.f32 %v4722_v61, %v4718_v54 }
0x17d3   :  { %4165 = vst.msk [vmem:[%s5694_s21 + $0x60] sm:$0xff] %vm218_vm2, %v2944_v62  ;;  %4545 = vmatmul.mubr.msk.f32.vlgmr.msra.gmra.mxu0 %vm218_vm2, %v2944_v62 }
0x17d4   :  { %v4724_v0 = vpop.eup %4723  ;;  %4553 = vmatpush3.xpose.msk.msra.mxu0 %vm218_vm2, %v3105_v60  ;;  %4554 = vmatprep.mubr.msk.f32.mxu0 %vm4794_vm1, %v4793_v34 }
0x17d5   :  { %v2946_v2 = vmul.f32 %v4724_v0, %v4720_v58  ;;  %4562 = vmatprep.subr.mxu0 %v4793_v34 }
0x17d7   :  { %4166 = vst.msk [vmem:[%s5694_s21 + $0x68] sm:$0xff] %vm218_vm2, %v2946_v2  ;;  %4550 = vmatmul.mubr.msk.f32.vlgmr.msra.gmra.mxu1 %vm218_vm2, %v2946_v2  ;;  %4555 = vmatmul.mubr.msk.f32.vlgmr.msra.gmra.mxu0 %vm218_vm2, %v3103_v39 }
0x17d8   :  { %4558 = vmatpush3.xpose.msk.msra.mxu1 %vm218_vm2, %v3183_v1  ;;  %4559 = vmatprep.mubr.msk.f32.mxu1 %vm4794_vm1, %v4793_v34 }
0x17d9   :  { %4567 = vmatprep.subr.mxu1 %v4793_v34  ;;  %4564 = vmatprep.mubr.msk.f32.mxu0 %vm4794_vm1, %v4793_v34 }
0x17db   :  { %4560 = vmatmul.mubr.msk.f32.vlgmr.msra.gmra.mxu1 %vm218_vm2, %v3181_v3 }
0x17dc   :  { %4569 = vmatprep.mubr.msk.f32.mxu1 %vm4794_vm1, %v4793_v34 }
0x1893   :  { %v3022_v4 = vpop.f32.mrf.mxu0 }
0x1895   :  { %v4546_v5 = vpop.f32.mrf.mxu0 }
0x1897   :  { %v3098_v6 = vpop.f32.mrf.mxu1  ;;  %v3176_v9 = vpop.f32.mrf.mxu0 }
0x1898   :  { %v3258_v10 = vmul.f32 0.35355338, %v3176_v9 }
0x1899   :  { %v4551_v13 = vpop.f32.mrf.mxu1  ;;  %v4556_v16 = vpop.f32.mrf.mxu0 }
0x189a   :  { %v3260_v17 = vadd.f32 %v5391_v59, %v3258_v10 }
0x189b   :  { %v3254_v18 = vpop.f32.mrf.mxu1 }
0x189c   :  { %v3259_v19 = vmul.f32 0.35355338, %v3254_v18  ;;  %v3262_v20 = vsel %vm218_vm2, %v3260_v17, -inf }
0x189d   :  { %3263 = vmax.xlane.f32.xlu0 %v3262_v20  ;;  %v4561_v21 = vpop.f32.mrf.mxu1  ;;  %v4190_v20 = vld [vmem:[%s5683_s10 + $0x28] sm:$0xff] }
0x189e   :  { %v3261_v22 = vadd.f32 %v5398_v63, %v3259_v19  ;;  %v4191_v19 = vld [vmem:[%s5683_s10 + $0x30] sm:$0xff]  ;;  %v4189_v21 = vld [vmem:[%s5683_s10 + $0x20] sm:$0xff] }
0x18a0   :  { %v3265_v23 = vsel %vm218_vm2, %v3261_v22, -inf }
0x18a1   :  { %3266 = vmax.xlane.f32.xlu1 %v3265_v23 }
0x18b2   :  { %3363 = vrot.lane.b32.xlu1 %v5320_v11, %s5751_s6 }
0x18b6   :  { %3441 = vrot.lane.b32.xlu1 %v5442_v27, %s5752_s29 }
0x18ba   :  { %3443 = vrot.lane.b32.xlu1 %v5444_v29, %s5752_s29  ;;  %s5754_s29 = smov 24  }
0x18be   :  { %3451 = vrot.lane.b32.xlu1 %v3098_v6, %s5753_s30 }
0x1926   :  { %v3264_v59 = vpop.xlane.xlu0 %3263 }
0x1927   :  { %v3268_v12 = vsub.f32 %v3260_v17, %v3264_v59 }
0x1929   :  { %v3270_v24 = vmul.f32 1.442695, %v3268_v12 }
0x192a   :  { %v3267_v25 = vpop.xlane.xlu1 %3266 }
0x192b   :  { %4725 = vpow2.f32 %v3270_v24  ;;  %v3269_v63 = vsub.f32 %v3261_v22, %v3267_v25 }
0x192d   :  { %v3272_v26 = vmul.f32 1.442695, %v3269_v63 }
0x192e   :  { %v3364_v43 = vpop.permute.xlu1 %3363 }
0x192f   :  { %4727 = vpow2.f32 %v3272_v26  ;;  %4568 = vmatpush3.msra.mxu1 %v3364_v43  ;;  %v4187_v26 = vld [vmem:[%s5681_s8 + $0x1] ss:$0 sm:$0xff] }
0x1932   :  { %v3442_v46 = vpop.permute.xlu1 %3441 }
0x1933   :  { %v3463_v50 = vsel %vm218_vm2, %v5384_v51, %v3442_v46  ;;  %v4182_v51 = vld [vmem:[%s5742_s28 + $0x1] ss:$0 sm:$0xff] }
0x1936   :  { %v3444_v47 = vpop.permute.xlu1 %3443 }
0x1937   :  { %v3464_v37 = vsel %vm218_vm2, %v5386_v53, %v3444_v47 }
0x1938   :  { %v4726_v28 = vpop.eup %4725 }
0x1939   :  { %v3274_v11 = vsel %vm218_vm2, %v4726_v28, 0.0 }
0x193a   :  { %3275 = vadd.xlane.f32.xlu0 %v3274_v11  ;;  %v3452_v52 = vpop.permute.xlu1 %3451 }
0x193b   :  { %v3466_v55 = vsel %vm1599_vm4, %v3464_v37, %v3452_v52 }
0x193c   :  { %v4728_v27 = vpop.eup %4727 }
0x193d   :  { %v3277_v14 = vsel %vm218_vm2, %v4728_v27, 0.0 }
0x193e   :  { %3278 = vadd.xlane.f32.xlu0 %v3277_v14 }
0x1954   :  { %3287 = vrot.lane.b32.xlu0 %v5322_v15, %s5751_s6  ;;  %v4180_v15 = vld [vmem:[%s5741_s4 + $0x38] sm:$0xff] }
0x1958   :  { %3449 = vrot.lane.b32.xlu0 %v3022_v4, %s5753_s30 }
0x19c3   :  { %v3276_v29 = vpop.xlane.xlu0 %3275 }
0x19c4   :  { %4729 = vrcp.f32 %v3276_v29 }
0x19c7   :  { %v3279_v30 = vpop.xlane.xlu0 %3278 }
0x19c8   :  { %4731 = vrcp.f32 %v3279_v30 }
0x19cb   :  { %v3288_v48 = vpop.permute.xlu0 %3287 }
0x19cc   :  { %4563 = vmatpush3.msra.mxu0 %v3288_v48 }
0x19cd   :  { %4572 = vmatprep.subr.mxu0 %v4180_v15 }
0x19cf   :  { %v3450_v49 = vpop.permute.xlu0 %3449 }
0x19d0   :  { %v3465_v54 = vsel %vm1599_vm4, %v3463_v50, %v3450_v49 }
0x19d1   :  { %v4730_v32 = vpop.eup %4729 }
0x19d2   :  { %v3281_v35 = vmul.f32 %v4730_v32, %v4726_v28  ;;  %v4188_v28 = vld [vmem:[%s5682_s9 + $0x1] ss:$0 sm:$0xff]  ;;  %v4204_v32 = vld [vmem:[%s5685_s12 + $0x78] sm:$0xff] }
0x19d4   :  { %4173 = vst.msk [vmem:[%s5694_s21 + $0x70] sm:$0xff] %vm218_vm2, %v3281_v35  ;;  %4565 = vmatmul.mubr.msk.f32.vlgmr.msra.gmra.mxu0 %vm218_vm2, %v3281_v35  ;;  %v4203_v35 = vld [vmem:[%s5685_s12 + $0x70] sm:$0xff] }
0x19d5   :  { %v4732_v36 = vpop.eup %4731  ;;  %4573 = vmatpush3.msra.mxu0 %v4180_v15  ;;  %v4200_v15 = vld [vmem:[%s5685_s12 + $0x58] sm:$0xff] }
0x19d6   :  { %v3283_v38 = vmul.f32 %v4732_v36, %v4728_v27  ;;  %4574 = vmatprep.subr.mxu0 %v4179_v40  ;;  %v4202_v36 = vld [vmem:[%s5685_s12 + $0x68] sm:$0xff] }
0x19d7   :  { %4575 = vmatpush3.msra.mxu0 %v4179_v40  ;;  %v4199_v40 = vld [vmem:[%s5685_s12 + $0x50] sm:$0xff] }
0x19d8   :  { %4174 = vst.msk [vmem:[%s5694_s21 + $0x78] sm:$0xff] %vm218_vm2, %v3283_v38  ;;  %4570 = vmatmul.mubr.msk.f32.vlgmr.msra.gmra.mxu1 %vm218_vm2, %v3283_v38  ;;  %4576 = vmatprep.subr.mxu0 %v4178_v41  ;;  %v4201_v38 = vld [vmem:[%s5685_s12 + $0x60] sm:$0xff] }
0x19d9   :  { %4577 = vmatpush3.msra.mxu0 %v4178_v41  ;;  %v4198_v41 = vld [vmem:[%s5685_s12 + $0x48] sm:$0xff] }
0x19da   :  { %4578 = vmatprep.subr.mxu0 %v4177_v42 }
0x19db   :  { %4579 = vmatpush3.msra.mxu0 %v4177_v42  ;;  %v4197_v42 = vld [vmem:[%s5685_s12 + $0x40] sm:$0xff] }
0x19dc   :  { %4594 = vmatprep.subr.mxu0 %v4204_v32 }
0x1a94   :  { %v3359_v44 = vpop.f32.mrf.mxu0 }
0x1a95   :  { %3457 = vrot.lane.b32.xlu0 %v3359_v44, %s5754_s29  ;;  %v4194_v44 = vld [vmem:[%s5684_s11 + $0x1] ss:$0 sm:$0xff] }
0x1a96   :  { %v4566_v45 = vpop.f32.mrf.mxu0 }
0x1a98   :  { %v3435_v33 = vpop.f32.mrf.mxu1 }
0x1a99   :  { %3459 = vrot.lane.b32.xlu1 %v3435_v33, %s5754_s29 }
0x1a9a   :  { %v4571_v31 = vpop.f32.mrf.mxu1 }
0x1b07   :  { %v3458_v56 = vpop.permute.xlu0 %3457 }
0x1b08   :  { %v3467_v58 = vsel %vm1602_vm3, %v3465_v54, %v3458_v56 }
0x1b09   :  { %4580 = vmatprep.mubr.msk.f32.mxu0 %vm77_vm0, %v3467_v58 }
0x1b0b   :  { %v3460_v57 = vpop.permute.xlu1 %3459 }
0x1b0c   :  { %v3468_v60 = vsel %vm1602_vm3, %v3466_v55, %v3460_v57 }
0x1b0d   :  { %4581 = vmatmul.mubr.msk.f32.vlgmr.msra.gmra.mxu0 %vm77_vm0, %v3468_v60 }
0x1b0e   :  { %4595 = vmatpush3.msra.mxu0 %v4204_v32 }
0x1b0f   :  { %4596 = vmatprep.subr.mxu0 %v4203_v35 }
0x1b10   :  { %4597 = vmatpush3.msra.mxu0 %v4203_v35  ;;  %v4212_v35 = vld [vmem:[%s5688_s15 + $0x1] ss:$0 sm:$0xff] }
0x1b11   :  { %4598 = vmatprep.subr.mxu0 %v4202_v36 }
0x1b12   :  { %4599 = vmatpush3.msra.mxu0 %v4202_v36 }
0x1b13   :  { %4600 = vmatprep.subr.mxu0 %v4201_v38 }
0x1b14   :  { %4601 = vmatpush3.msra.mxu0 %v4201_v38 }
0x1b15   :  { %4602 = vmatprep.subr.mxu0 %v4200_v15 }
0x1b16   :  { %4603 = vmatpush3.msra.mxu0 %v4200_v15 }
0x1b17   :  { %4604 = vmatprep.subr.mxu0 %v4199_v40 }
0x1b18   :  { %4605 = vmatpush3.msra.mxu0 %v4199_v40 }
0x1b19   :  { %4606 = vmatprep.subr.mxu0 %v4198_v41 }
0x1b1a   :  { %4607 = vmatpush3.msra.mxu0 %v4198_v41 }
0x1b1b   :  { %4608 = vmatprep.subr.mxu0 %v4197_v42 }
0x1b1c   :  { %4609 = vmatpush3.msra.mxu0 %v4197_v42 }
0x1bcd   :  { %v4582_v61 = vpop.f32.mrf.mxu0 }
0x1bce   :  { %v3560_v62 = vadd.f32 %v4582_v61, %v4182_v51 }
0x1bcf   :  { %v3554_v0 = vpop.f32.mrf.mxu0 }
0x1bd0   :  { %v3564_v1 = vadd.f32 %v3560_v62, %v5297_v7  ;;  %v3555_v2 = vadd.f32 %v4182_v51, %v3554_v0 }
0x1bd2   :  { %v3563_v39 = vadd.f32 %v3555_v2, %v5299_v8  ;;  %v3572_v53 = vsel %vm77_vm0, %v3564_v1, 0.0  ;;  %v4192_v8 = vld [vmem:[%s5683_s10 + $0x38] sm:$0xff] }
0x1bd3   :  { %3573 = vadd.xlane.f32.xlu1 %v3572_v53  ;;  %4583 = vmatprep.subr.mxu1 %v4192_v8  ;;  %v4206_v53 = vld [vmem:[%s5686_s13 + $0x1] ss:$0 sm:$0xff]  ;;  %s4809_s13 = smov [#allocation2]  }
0x1bd4   :  { %v3569_v3 = vsel %vm77_vm0, %v3563_v39, 0.0  ;;  %4584 = vmatpush3.msra.mxu1 %v4192_v8  ;;  %s4059_s10 = sshll.u32 %s4809_s13, 4  ;;  %s4060_s10 = int_to_ptr.vmem [resolvable:$true] %s4059_s10 }
0x1bd5   :  { %3570 = vadd.xlane.f32.xlu0 %v3569_v3  ;;  %4585 = vmatprep.subr.mxu1 %v4191_v19  ;;  %p4754_p1 = scmp.lt.s32.totalorder %s4060_s10, %s4060_s10 }
0x1bd6   :  { %4586 = vmatpush3.msra.mxu1 %v4191_v19 }
0x1bd7   :  { %4587 = vmatprep.subr.mxu1 %v4190_v20 }
0x1bd8   :  { %4588 = vmatpush3.msra.mxu1 %v4190_v20 }
0x1bd9   :  { %4589 = vmatprep.subr.mxu1 %v4189_v21 }
0x1bda   :  { %4590 = vmatpush3.msra.mxu1 %v4189_v21 }
0x1bdb   :  { %4613 = vmatprep.subr.mxu1 %v4793_v34 }
0x1c5c   :  { %v3574_v4 = vpop.xlane.xlu1 %3573 }
0x1c5d   :  { %v3576_v5 = vmul.f32 0.03125, %v3574_v4 }
0x1c5e   :  { %v3571_v6 = vpop.xlane.xlu0 %3570 }
0x1c5f   :  { %v3575_v9 = vmul.f32 0.03125, %v3571_v6  ;;  %v3578_v10 = vsub.f32 %v3564_v1, %v3576_v5 }
0x1c61   :  { %v3577_v13 = vsub.f32 %v3563_v39, %v3575_v9  ;;  %v3580_v18 = vmul.f32 %v3578_v10, %v3578_v10 }
0x1c63   :  { %v3579_v16 = vmul.f32 %v3577_v13, %v3577_v13  ;;  %v3584_v7 = vsel %vm77_vm0, %v3580_v18, 0.0 }
0x1c65   :  { %v3581_v17 = vsel %vm77_vm0, %v3579_v16, 0.0 }
0x1c66   :  { %3582 = vadd.xlane.f32.xlu0 %v3581_v17 }
0x1c6a   :  { %3585 = vadd.xlane.f32.xlu0 %v3584_v7 }
0x1cef   :  { %v3583_v22 = vpop.xlane.xlu0 %3582 }
0x1cf0   :  { %v3587_v23 = vmul.f32 0.03125, %v3583_v22 }
0x1cf2   :  { %v3589_v59 = vadd.f32 1e-12, %v3587_v23 }
0x1cf3   :  { %v3586_v12 = vpop.xlane.xlu0 %3585 }
0x1cf4   :  { %4733 = vrsqrt.f32 %v3589_v59  ;;  %v3588_v24 = vmul.f32 0.03125, %v3586_v12  ;;  %v3875_v12 = vld [vmem:[%s5689_s16 + $0x18] sm:$0xff] }
0x1cf6   :  { %v3590_v25 = vadd.f32 1e-12, %v3588_v24  ;;  %v3874_v24 = vld [vmem:[%s5689_s16 + $0x10] sm:$0xff] }
0x1cf8   :  { %4735 = vrsqrt.f32 %v3590_v25  ;;  %v3873_v25 = vld [vmem:[%s5689_s16 + $0x8] sm:$0xff] }
0x1d01   :  { %v4734_v63 = vpop.eup %4733 }
0x1d02   :  { %v3593_v43 = vmul.f32 %v4734_v63, %v3577_v13  ;;  %v3872_v63 = vld [vmem:[%s5689_s16] sm:$0xff] }
0x1d04   :  { %v3601_v11 = vmul.f32 %v4187_v26, %v3593_v43 }
0x1d05   :  { %v4736_v27 = vpop.eup %4735 }
0x1d06   :  { %v3594_v14 = vmul.f32 %v4736_v27, %v3578_v10  ;;  %v5568_v29 = vadd.f32 %v4188_v28, %v3601_v11 }
0x1d08   :  { %v3602_v30 = vmul.f32 %v4187_v26, %v3594_v14  ;;  %4591 = vmatprep.mubr.msk.f32.mxu1 %vm77_vm0, %v5568_v29 }
0x1d0a   :  { %v3610_v48 = vadd.f32 %v4188_v28, %v3602_v30  ;;  %v4211_v30 = vld [vmem:[%s5687_s14 + $0x1] ss:$0 sm:$0xff] }
0x1d0c   :  { %4592 = vmatmul.mubr.msk.f32.vlgmr.msra.gmra.mxu1 %vm77_vm0, %v3610_v48 }
0x1d0d   :  { %4621 = vmatprep.mubr.msk.f32.mxu1 %vm4794_vm1, %v4793_v34  ;;  %4614 = vmatpush3.msra.mxu1 %v3875_v12 }
0x1d0e   :  { %4615 = vmatprep.subr.mxu1 %v4793_v34 }
0x1d0f   :  { %4616 = vmatpush3.msra.mxu1 %v3874_v24 }
0x1d10   :  { %4617 = vmatprep.subr.mxu1 %v4793_v34 }
0x1d11   :  { %4618 = vmatpush3.msra.mxu1 %v3873_v25 }
0x1d12   :  { %4619 = vmatprep.subr.mxu1 %v4793_v34 }
0x1d13   :  { %4620 = vmatpush3.msra.mxu1 %v3872_v63 }
0x1d14   :  { %4624 = vmatprep.subr.mxu1 %v4793_v34 }
0x1dcc   :  { %v4593_v45 = vpop.f32.mrf.mxu1 }
0x1dcd   :  { %v3702_v33 = vadd.f32 %v4593_v45, %v4194_v44  ;;  %v3966_v45 = vld [vmem:[%s5691_s18 + $0x18] sm:$0xff] }
0x1dce   :  { %v3696_v31 = vpop.f32.mrf.mxu1 }
0x1dcf   :  { %v3708_v46 = vmul.f32 0.044715, %v3702_v33  ;;  %v3697_v47 = vadd.f32 %v4194_v44, %v3696_v31  ;;  %v3706_v1 = vmul.f32 0.5, %v3702_v33  ;;  %v3964_v31 = vld [vmem:[%s5691_s18 + $0x8] sm:$0xff] }
0x1dd1   :  { %v3710_v49 = vmul.f32 %v3708_v46, %v3702_v33  ;;  %v3707_v50 = vmul.f32 0.044715, %v3697_v47  ;;  %v3705_v62 = vmul.f32 0.5, %v3697_v47  ;;  %v3963_v46 = vld [vmem:[%s5691_s18] sm:$0xff] }
0x1dd3   :  { %v3712_v52 = vmul.f32 %v3710_v49, %v3702_v33  ;;  %v3709_v54 = vmul.f32 %v3707_v50, %v3697_v47 }
0x1dd5   :  { %v3714_v56 = vadd.f32 %v3712_v52, %v3702_v33  ;;  %v3711_v58 = vmul.f32 %v3709_v54, %v3697_v47  ;;  %v3965_v33 = vld [vmem:[%s5691_s18 + $0x10] sm:$0xff]  ;;  %s4749_s18 = scalar_lea.vmem %s4060_s10, 32 }
0x1dd6   :  { %p4750_p0 = scmp.ne.s32.totalorder %s4060_s10, %s4749_s18  ;;  %p4755_p2 = scmp.lt.s32.totalorder %s4749_s18, %s4749_s18 }
0x1dd7   :  { %v3716_v37 = vmul.f32 0.7978846, %v3714_v56  ;;  %v3713_v55 = vadd.f32 %v3711_v58, %v3697_v47  ;;  %v4215_v47 = vld [vmem:[%s5690_s17] ss:$0 sm:$0xff] }
0x1dd8   :  { %p4756_p3 = por %p4755_p2, %p4754_p1 }
0x1dd9   :  { %4737 = vtanh.f32 %v3716_v37  ;;  %v3715_v57 = vmul.f32 0.7978846, %v3713_v55 }
0x1dda   :  { %p4757_p4 = pnand %p4756_p3, %p4750_p0 }
0x1ddb   :  { %4739 = vtanh.f32 %v3715_v57 }
0x1de6   :  { %v4738_v60 = vpop.eup %4737 }
0x1de7   :  { %v3720_v61 = vadd.f32 1.0, %v4738_v60 }
0x1de8   :  { %v4740_v51 = vpop.eup %4739 }
0x1de9   :  { %v3719_v0 = vadd.f32 1.0, %v4740_v51  ;;  %v3722_v39 = vmul.f32 %v3720_v61, %v3706_v1 }
0x1deb   :  { %v3721_v2 = vmul.f32 %v3719_v0, %v3705_v62 }
0x1ded   :  { %4610 = vmatprep.mubr.msk.f32.mxu0 %vm1868_vm5, %v3721_v2 }
0x1dee   :  { %4611 = vmatmul.mubr.msk.f32.vlgmr.msra.gmra.mxu0 %vm1868_vm5, %v3722_v39 }
0x1eae   :  { %v4612_v3 = vpop.f32.mrf.mxu0 }
0x1eaf   :  { %v3818_v4 = vadd.f32 %v4612_v3, %v4206_v53 }
0x1eb0   :  { %v3812_v5 = vpop.f32.mrf.mxu0 }
0x1eb1   :  { %v3822_v6 = vadd.f32 %v3818_v4, %v3610_v48  ;;  %v3813_v9 = vadd.f32 %v4206_v53, %v3812_v5 }
0x1eb3   :  { %v3821_v10 = vadd.f32 %v3813_v9, %v5568_v29  ;;  %v3830_v13 = vsel %vm77_vm0, %v3822_v6, 0.0 }
0x1eb4   :  { %3831 = vadd.xlane.f32.xlu0 %v3830_v13 }
0x1eb5   :  { %v3827_v16 = vsel %vm77_vm0, %v3821_v10, 0.0 }
0x1eb6   :  { %3828 = vadd.xlane.f32.xlu1 %v3827_v16 }
0x1f3d   :  { %v3832_v17 = vpop.xlane.xlu0 %3831 }
0x1f3e   :  { %v3834_v18 = vmul.f32 0.03125, %v3832_v17 }
0x1f3f   :  { %v3829_v7 = vpop.xlane.xlu1 %3828 }
0x1f40   :  { %v3836_v8 = vsub.f32 %v3822_v6, %v3834_v18  ;;  %v3833_v19 = vmul.f32 0.03125, %v3829_v7 }
0x1f42   :  { %v3835_v20 = vsub.f32 %v3821_v10, %v3833_v19  ;;  %v3838_v21 = vmul.f32 %v3836_v8, %v3836_v8 }
0x1f44   :  { %v3842_v22 = vsel %vm77_vm0, %v3838_v21, 0.0  ;;  %v3837_v23 = vmul.f32 %v3835_v20, %v3835_v20 }
0x1f45   :  { %3843 = vadd.xlane.f32.xlu0 %v3842_v22 }
0x1f46   :  { %v3839_v59 = vsel %vm77_vm0, %v3837_v23, 0.0 }
0x1f47   :  { %3840 = vadd.xlane.f32.xlu1 %v3839_v59 }
0x1fce   :  { %v3844_v26 = vpop.xlane.xlu0 %3843 }
0x1fcf   :  { %v3846_v43 = vmul.f32 0.03125, %v3844_v26 }
0x1fd0   :  { %v3841_v28 = vpop.xlane.xlu1 %3840 }
0x1fd1   :  { %v3848_v11 = vadd.f32 1e-12, %v3846_v43  ;;  %v3845_v27 = vmul.f32 0.03125, %v3841_v28 }
0x1fd3   :  { %4741 = vrsqrt.f32 %v3848_v11  ;;  %v3847_v14 = vadd.f32 1e-12, %v3845_v27 }
0x1fd5   :  { %4743 = vrsqrt.f32 %v3847_v14 }
0x1fe0   :  { %v4742_v29 = vpop.eup %4741 }
0x1fe1   :  { %v3852_v48 = vmul.f32 %v4742_v29, %v3836_v8 }
0x1fe2   :  { %v4744_v32 = vpop.eup %4743 }
0x1fe3   :  { %v3851_v36 = vmul.f32 %v4744_v32, %v3835_v20  ;;  %v3860_v38 = vmul.f32 %v4211_v30, %v3852_v48 }
0x1fe5   :  { %v3859_v15 = vmul.f32 %v4211_v30, %v3851_v36  ;;  %v3868_v40 = vadd.f32 %v4212_v35, %v3860_v38 }
0x1fe7   :  { %v3867_v41 = vadd.f32 %v4212_v35, %v3859_v15  ;;  %4214 = vst.msk [vmem:[%s5693_s20 + $0x28] sm:$0xff] %vm77_vm0, %v3868_v40  ;;  %v3885_v42 = vrot.slane %v3868_v40, 7 }
0x1fe9   :  { %4213 = vst.msk [vmem:[%s5693_s20 + $0x20] sm:$0xff] %vm77_vm0, %v3867_v41  ;;  %v3887_v44 = vsel %vm3886_vm6, %v3885_v42, %v3867_v41 }
0x1fea   :  { %4622 = vmatmul.mubr.msk.f32.vlgmr.msra.gmra.mxu1 %vm77_vm0, %v3887_v44 }
0x1feb   :  { %4632 = vmatprep.mubr.msk.f32.mxu1 %vm4794_vm1, %v4793_v34  ;;  %4625 = vmatpush3.msra.mxu1 %v3966_v45 }
0x1fec   :  { %4626 = vmatprep.subr.mxu1 %v4793_v34 }
0x1fed   :  { %4627 = vmatpush3.msra.mxu1 %v3965_v33 }
0x1fee   :  { %4628 = vmatprep.subr.mxu1 %v4793_v34 }
0x1fef   :  { %4629 = vmatpush3.msra.mxu1 %v3964_v31 }
0x1ff0   :  { %4630 = vmatprep.subr.mxu1 %v4793_v34 }
0x1ff1   :  { %4631 = vmatpush3.msra.mxu1 %v3963_v46 }
0x20aa   :  { %v3956_v49 = vpop.f32.mrf.mxu1 }
0x20ab   :  { %v3957_v50 = vadd.f32 %v4215_v47, %v3956_v49 }
0x20ac   :  { %v4623_v52 = vpop.f32.mrf.mxu1 }
0x20ad   :  { %4745 = vtanh.f32 %v3957_v50 }
0x20ba   :  { %v4746_v54 = vpop.eup %4745 }
0x20bb   :  { %4633 = vmatmul.mubr.msk.f32.vlgmr.msra.gmra.mxu1 %vm77_vm0, %v4746_v54  ;;  %3962 = vst.msk [vmem:[#allocation2] sm:$0x3] %vm3961_vm7, %v4746_v54 }
0x20bc   :  { %4760 = shalt.err (!%p4757_p4)
}
0x20bd   :  { %4062 = dma.vmem_to_hbm [thread:$0]  %s4060_s10, 32, %s5695_s22, [#allocation3]   ;;  %v4217_v34 = vld [vmem:[%s5692_s19] ss:$0 sm:$0xff]  ;;  %vm4047_vm8 = vcmask 9216  }
0x20be   :  { %s4810_s6 = smov [#allocation4]  }
0x20bf   :  { %s4069_s29 = sshll.u32 %s4810_s6, 4  ;;  %s4070_s29 = int_to_ptr.vmem [resolvable:$true] %s4069_s29 }
0x20c0   :  { %s4769_s4 = scalar_lea.vmem %s4070_s29, 32  ;;  %p4774_p6 = scmp.lt.s32.totalorder %s4070_s29, %s4070_s29 }
0x20c1   :  { %p4770_p5 = scmp.ne.s32.totalorder %s4070_s29, %s4769_s4  ;;  %p4775_p7 = scmp.lt.s32.totalorder %s4769_s4, %s4769_s4 }
0x20c3   :  { %p4776_p8 = por %p4775_p7, %p4774_p6 }
0x20c5   :  { %p4777_p9 = pnand %p4776_p8, %p4770_p5 }
0x217b   :  { %v4043_v56 = vpop.f32.mrf.mxu1 }
0x217c   :  { %v4044_v58 = vadd.f32 %v4217_v34, %v4043_v56 }
0x217d   :  { %v4634_v37 = vpop.f32.mrf.mxu1 }
0x217e   :  { %4048 = vst.msk [vmem:[#allocation4] sm:$0x3] %vm4047_vm8, %v4044_v58 }
0x217f   :  { %4780 = shalt.err (!%p4777_p9)
}
0x2180   :  { %4072 = dma.vmem_to_hbm [thread:$0]  %s4070_s29, 32, %s5696_s23, [#allocation5]  }
0x2181   :  { %4789 = dma.done.wait [#allocation3], 32  }
0x2182   :  { %4790 = vsyncadd [#allocation3], 4294967264 }
0x2183   :  { %4791 = dma.done.wait [#allocation5], 32  }
0x2184   :  { %4792 = vsyncadd [#allocation5], 4294967264 }
0x2185   :  { %4083 = vsyncpa [#allocation3], 1 }
0x2186   :  { %4084 = vsyncpa [#allocation5], 1 }

</bundles_post_ra>
